<compile_context>
chip_gen: v5e
topology: v5e:2x2
jax: 0.10.0
libtpu: 0.0.40
codegen_flags: <defaults>
</compile_context>

<pallas_src>
import functools

import jax
import jax.numpy as jnp
from jax.experimental import pallas as pl
from jax.experimental.pallas import tpu as pltpu

LANE = 128


# ----------------------------- Pallas kernels ------------------------------ #
def gcn_conv_fused_kernel(adj_ref, x_ref, w_ref, b_ref, o_ref, acc_ref):
    """Layer-1 tile: acc[i] += A[i,k] @ (X[k] @ W); ReLU + bf16 store at last k."""
    k = pl.program_id(1)

    @pl.when(k == 0)
    def _init():
        acc_ref[...] = jnp.zeros_like(acc_ref)

    # (X_k @ W): bf16 operands on the MXU, f32 result.  X is only 32 lanes wide,
    # so keeping this fused is cheaper than streaming a precomputed [Np,128] XW.
    xw = jnp.dot(x_ref[...], w_ref[...], preferred_element_type=jnp.float32)
    # A_ik @ (X_k W): bf16 operands, f32 accumulator resident in VMEM scratch.
    acc_ref[...] += jnp.dot(adj_ref[...], xw.astype(jnp.bfloat16),
                            preferred_element_type=jnp.float32)

    @pl.when(k == pl.num_programs(1) - 1)
    def _finalize():
        h = acc_ref[...] + b_ref[...]          # f32 elementwise
        h = jnp.maximum(h, 0.0)                # ReLU
        o_ref[...] = h.astype(o_ref.dtype)     # bf16 (feeds next matmul only)


def gcn_conv_premm_kernel(adj_ref, xw_ref, b_ref, o_ref, *, num_valid_cols):
    """Layer-2 tile: o[i] += A[i,k] @ XW[k]; bias + masked log_softmax at last k.

    XW is precomputed in the wrapper (hoisted out of the k-loop).  The f32
    output block is resident across k (out index_map ignores k), so it doubles
    as the accumulator -- no scratch needed.
    """
    k = pl.program_id(1)

    @pl.when(k == 0)
    def _init():
        o_ref[...] = jnp.zeros_like(o_ref)

    o_ref[...] += jnp.dot(adj_ref[...], xw_ref[...],
                          preferred_element_type=jnp.float32)

    @pl.when(k == pl.num_programs(1) - 1)
    def _finalize():
        h = o_ref[...] + b_ref[...]
        # Mask lane-padded class columns before the softmax reduction.
        col = jax.lax.broadcasted_iota(jnp.int32, h.shape, 1)
        h = jnp.where(col < num_valid_cols, h, -1e30)
        m = jnp.max(h, axis=1, keepdims=True)
        z = h - m
        lse = jnp.log(jnp.sum(jnp.exp(z), axis=1, keepdims=True))
        o_ref[...] = z - lse


# ------------------------------ call wrappers ------------------------------ #
def _round_up(v, m):
    return (v + m - 1) // m * m


def _pick_tile(n, candidates):
    for c in candidates:
        if n % c == 0:
            return c
    return n


def _choose_row_tile(n):
    """Largest row tile (<=1024) whose extra padded rows stay <= ~12.5%."""
    n128 = max(_round_up(n, LANE), LANE)
    budget = n128 + n128 // 8
    for tm in (1024, 512, 256, 128):
        np_ = _round_up(n, tm)
        if np_ <= budget:
            return tm, np_
    return LANE, n128


_DIM_SEMANTICS = ("parallel", "arbitrary")   # rows parallel, k-reduction last


def gcn_conv_fused(adj, x, w, b):
    """bf16 ReLU(A_hat @ (x @ w) + b).  adj:[Np,Np] bf16, x:[Np,Fin] bf16."""
    n = adj.shape[0]
    f_in = x.shape[1]
    f_out = w.shape[1]
    tm = _pick_tile(n, (1024, 512, 256, 128))
    tk = _pick_tile(n, (2048, 1024, 512, 256, 128))
    grid = (n // tm, n // tk)
    return pl.pallas_call(
        gcn_conv_fused_kernel,
        out_shape=jax.ShapeDtypeStruct((n, f_out), jnp.bfloat16),
        grid_spec=pltpu.PrefetchScalarGridSpec(
            num_scalar_prefetch=0,
            grid=grid,
            in_specs=[
                pl.BlockSpec((tm, tk), lambda i, k: (i, k)),       # A_hat tile
                pl.BlockSpec((tk, f_in), lambda i, k: (k, 0)),     # X (k rows)
                pl.BlockSpec((f_in, f_out), lambda i, k: (0, 0)),  # W (resident)
                pl.BlockSpec((1, f_out), lambda i, k: (0, 0)),     # bias (resident)
            ],
            out_specs=pl.BlockSpec((tm, f_out), lambda i, k: (i, 0)),
            scratch_shapes=[pltpu.VMEM((tm, f_out), jnp.float32)],
        ),
        compiler_params=pltpu.CompilerParams(
            dimension_semantics=_DIM_SEMANTICS),
    )(adj, x, w, b)


def gcn_conv_premm(adj, xw, b, *, num_valid_cols):
    """f32 log_softmax(A_hat @ xw + b) with padded class lanes masked."""
    n = adj.shape[0]
    f_out = xw.shape[1]
    tm = _pick_tile(n, (1024, 512, 256, 128))
    tk = _pick_tile(n, (2048, 1024, 512, 256, 128))
    grid = (n // tm, n // tk)
    kernel = functools.partial(gcn_conv_premm_kernel,
                               num_valid_cols=num_valid_cols)
    return pl.pallas_call(
        kernel,
        out_shape=jax.ShapeDtypeStruct((n, f_out), jnp.float32),
        grid_spec=pltpu.PrefetchScalarGridSpec(
            num_scalar_prefetch=0,
            grid=grid,
            in_specs=[
                pl.BlockSpec((tm, tk), lambda i, k: (i, k)),       # A_hat tile
                pl.BlockSpec((tk, f_out), lambda i, k: (k, 0)),    # XW (k rows)
                pl.BlockSpec((1, f_out), lambda i, k: (0, 0)),     # bias (resident)
            ],
            # Output block is the accumulator (resident across k).
            out_specs=pl.BlockSpec((tm, f_out), lambda i, k: (i, 0)),
        ),
        compiler_params=pltpu.CompilerParams(
            dimension_semantics=_DIM_SEMANTICS),
    )(adj, xw, b)


# ------------------------------ Forward pass ------------------------------- #
@functools.partial(jax.jit, static_argnames=("num_classes",))
def gcn_forward(x, adj_p, w1, b1, w2, b2, num_classes):
    """adj_p: pre-normalized, pre-padded [Np,Np] bf16 adjacency."""
    n, f_in = x.shape
    np_ = adj_p.shape[0]
    hidden = w1.shape[1]

    # Lane-pad parameters to 128 output features / classes (zeros).
    w1p = jnp.zeros((f_in, LANE), jnp.bfloat16).at[:, :hidden].set(
        w1.astype(jnp.bfloat16))
    b1p = jnp.zeros((1, LANE), jnp.float32).at[:, :hidden].set(b1.reshape(1, -1))
    w2p = jnp.zeros((LANE, LANE), jnp.bfloat16).at[:hidden, :num_classes].set(
        w2.astype(jnp.bfloat16))
    b2p = jnp.zeros((1, LANE), jnp.float32).at[:, :num_classes].set(b2.reshape(1, -1))

    # Row-pad features to the adjacency's padded node count; bf16 MXU operands.
    x_p = jnp.zeros((np_, f_in), jnp.bfloat16).at[:n, :].set(x.astype(jnp.bfloat16))

    # conv1 + ReLU (h1 kept bf16: it only feeds the next matmul).
    h1 = gcn_conv_fused(adj_p, x_p, w1p, b1p)
    # dropout(training=False) == identity
    # conv2: hoist X@W out of the k-loop -- one [Np,128]@[128,128] XLA matmul.
    xw2 = jnp.dot(h1, w2p, preferred_element_type=jnp.float32).astype(jnp.bfloat16)
    out = gcn_conv_premm(adj_p, xw2, b2p, num_valid_cols=num_classes)
    return out[:n, :num_classes]


# ------------------------------ JAX glue ----------------------------------- #
def build_normalized_adjacency(edge_index, num_nodes, padded_nodes=None,
                               dtype=jnp.bfloat16):
    """Dense A_hat = D^-1/2 (A + I) D^-1/2 (PyG gcn_norm), built directly in the
    padded [Np,Np] shape and cast once to the kernel dtype."""
    if padded_nodes is None:
        padded_nodes = num_nodes
    src = edge_index[0]
    dst = edge_index[1]
    a = jnp.zeros((padded_nodes, padded_nodes), jnp.float32)
    # message flows src -> dst; duplicates accumulate (PyG multigraph parity).
    a = a.at[dst, src].add(1.0)
    # self-loops only on real nodes; padded rows/cols stay all-zero.
    valid = (jnp.arange(padded_nodes) < num_nodes).astype(jnp.float32)
    a = a + jnp.diag(valid)
    deg = jnp.sum(a, axis=1)
    d_inv_sqrt = jnp.where(deg > 0, 1.0 / jnp.sqrt(deg), 0.0)
    a_hat = d_inv_sqrt[:, None] * a * d_inv_sqrt[None, :]
    return a_hat.astype(dtype)


def glorot(key, shape):
    fan_in, fan_out = shape
    limit = jnp.sqrt(6.0 / (fan_in + fan_out))
    return jax.random.uniform(key, shape, jnp.float32, -limit, limit)


def reference_forward(x, adj, w1, b1, w2, b2):
    h1 = jnp.maximum(adj @ (x @ w1) + b1, 0.0)
    h2 = adj @ (h1 @ w2) + b2
    return jax.nn.log_softmax(h2, axis=1)


if __name__ == "__main__":
    N = 200          # number of nodes (exercises the row-padding path)
    F_IN = 32        # dataset.num_features
    HIDDEN = 16
    NUM_CLASSES = 8  # dataset.num_classes
    NUM_EDGES = 512

    key = jax.random.PRNGKey(0)
    k_x, k_e, k_w1, k_w2 = jax.random.split(key, 4)

    # deterministic synthetic graph data
    x = jax.random.normal(k_x, (N, F_IN), jnp.float32)
    edge_index = jax.random.randint(k_e, (2, NUM_EDGES), 0, N, jnp.int32)

    # deterministic parameters (GCNConv: glorot weight, zero bias)
    w1 = glorot(k_w1, (F_IN, HIDDEN))
    b1 = jnp.zeros((HIDDEN,), jnp.float32)
    w2 = glorot(k_w2, (HIDDEN, NUM_CLASSES))
    b2 = jnp.zeros((NUM_CLASSES,), jnp.float32)

    # Pad node count up to the chosen row tile so the big tile is selectable,
    # and build the normalized adjacency directly in padded bf16.
    _, NP = _choose_row_tile(N)
    adj_p = build_normalized_adjacency(edge_index, N, NP, jnp.bfloat16)

    out = gcn_forward(x, adj_p, w1, b1, w2, b2, num_classes=NUM_CLASSES)
    out = jax.block_until_ready(out)

    # f32 reference (unpadded, full-precision adjacency).
    adj_f32 = build_normalized_adjacency(edge_index, N, N, jnp.float32)
    ref = reference_forward(x, adj_f32, w1, b1, w2, b2)

    assert out.shape == (N, NUM_CLASSES)
    # bf16 MXU operands / bf16 adj with f32 accumulation -> relaxed tolerance.
    err = float(jnp.max(jnp.abs(out - ref)))
    assert jnp.allclose(out, ref, atol=5e-2, rtol=5e-2), f"max abs err {err}"

    print("KERNEL_OK")
</pallas_src>

<mosaic_0001>
module attributes {stable_mosaic.version = 11 : i64} {
  func.func @gcn_conv_fused_kernel(%arg0: i32, %arg1: i32, %arg2: memref<256x256xbf16, #tpu.memory_space<vmem>>, %arg3: memref<256x32xbf16, #tpu.memory_space<vmem>>, %arg4: memref<32x128xbf16, #tpu.memory_space<vmem>>, %arg5: memref<1x128xf32, #tpu.memory_space<vmem>>, %arg6: memref<256x128xbf16, #tpu.memory_space<vmem>>, %arg7: memref<256x128xf32, #tpu.memory_space<vmem>>) attributes {dimension_semantics = [#tpu.dimension_semantics<parallel>, #tpu.dimension_semantics<arbitrary>], iteration_bounds = array<i64: 1, 1>, scalar_prefetch = 0 : i64, scratch_operands = 1 : i64, tpu.core_type = #tpu.core_type<tc>, window_params = [{transform_indices = @transform_0, window_bounds = array<i64: 256, 256>}, {transform_indices = @transform_1, window_bounds = array<i64: 256, 32>}, {pipeline_mode = #tpu.pipeline_mode<synchronous>, transform_indices = @transform_2, window_bounds = array<i64: 32, 128>}, {pipeline_mode = #tpu.pipeline_mode<synchronous>, transform_indices = @transform_3, window_bounds = array<i64: 1, 128>}, {transform_indices = @transform_4, window_bounds = array<i64: 256, 128>}]} {
    %c0_i32 = arith.constant 0 : i32
    %0 = arith.cmpi eq, %arg1, %c0_i32 : i32
    %1 = arith.extui %0 : i1 to i32
    %c0_i32_0 = arith.constant 0 : i32
    %2 = arith.cmpi ne, %1, %c0_i32_0 : i32
    scf.if %2 {
      %cst_13 = arith.constant 0.000000e+00 : f32
      %15 = vector.broadcast %cst_13 : f32 to vector<256x128xf32>
      %c0_14 = arith.constant 0 : index
      %c0_15 = arith.constant 0 : index
      %16 = vector.load %arg7[%c0_14, %c0_15] : memref<256x128xf32, #tpu.memory_space<vmem>>, vector<256x128xf32>
      tpu.vector_store %arg7[%c0_14, %c0_15], %15 {strides = array<i32>} : memref<256x128xf32, #tpu.memory_space<vmem>>, vector<256x128xf32>,
    } else {
    }
    %c0 = arith.constant 0 : index
    %c0_1 = arith.constant 0 : index
    %3 = vector.load %arg3[%c0, %c0_1] : memref<256x32xbf16, #tpu.memory_space<vmem>>, vector<256x32xbf16>
    %c0_2 = arith.constant 0 : index
    %c0_3 = arith.constant 0 : index
    %4 = vector.load %arg4[%c0_2, %c0_3] : memref<32x128xbf16, #tpu.memory_space<vmem>>, vector<32x128xbf16>
    %cst = arith.constant dense<0.000000e+00> : vector<256x128xf32>
    %5 = tpu.matmul %3, %4, %cst {dimension_numbers = #tpu.dot_dimension_numbers<[1], [0], [0], [1], [0, 0, 1, 1], [], []>} : vector<256x32xbf16>, vector<32x128xbf16>, vector<256x128xf32> -> vector<256x128xf32>
    %c0_4 = arith.constant 0 : index
    %c0_5 = arith.constant 0 : index
    %6 = vector.load %arg7[%c0_4, %c0_5] : memref<256x128xf32, #tpu.memory_space<vmem>>, vector<256x128xf32>
    %c0_6 = arith.constant 0 : index
    %c0_7 = arith.constant 0 : index
    %7 = vector.load %arg2[%c0_6, %c0_7] : memref<256x256xbf16, #tpu.memory_space<vmem>>, vector<256x256xbf16>
    %8 = arith.truncf %5 : vector<256x128xf32> to vector<256x128xbf16>
    %cst_8 = arith.constant dense<0.000000e+00> : vector<256x128xf32>
    %9 = tpu.matmul %7, %8, %cst_8 {dimension_numbers = #tpu.dot_dimension_numbers<[1], [0], [0], [1], [0, 0, 1, 1], [], []>} : vector<256x256xbf16>, vector<256x128xbf16>, vector<256x128xf32> -> vector<256x128xf32>
    %10 = arith.addf %6, %9 : vector<256x128xf32>
    %c0_9 = arith.constant 0 : index
    %c0_10 = arith.constant 0 : index
    %11 = vector.load %arg7[%c0_9, %c0_10] : memref<256x128xf32, #tpu.memory_space<vmem>>, vector<256x128xf32>
    tpu.vector_store %arg7[%c0_9, %c0_10], %10 {strides = array<i32>} : memref<256x128xf32, #tpu.memory_space<vmem>>, vector<256x128xf32>,
    %c0_i32_11 = arith.constant 0 : i32
    %12 = arith.cmpi eq, %arg1, %c0_i32_11 : i32
    %13 = arith.extui %12 : i1 to i32
    %c0_i32_12 = arith.constant 0 : i32
    %14 = arith.cmpi ne, %13, %c0_i32_12 : i32
    scf.if %14 {
      %c0_13 = arith.constant 0 : index
      %c0_14 = arith.constant 0 : index
      %15 = vector.load %arg7[%c0_13, %c0_14] : memref<256x128xf32, #tpu.memory_space<vmem>>, vector<256x128xf32>
      %c0_15 = arith.constant 0 : index
      %c0_16 = arith.constant 0 : index
      %16 = vector.load %arg5[%c0_15, %c0_16] : memref<1x128xf32, #tpu.memory_space<vmem>>, vector<1x128xf32>
      %17 = vector.broadcast %16 : vector<1x128xf32> to vector<256x128xf32>
      %18 = arith.addf %15, %17 : vector<256x128xf32>
      %cst_17 = arith.constant 0.000000e+00 : f32
      %19 = vector.broadcast %cst_17 : f32 to vector<256x128xf32>
      %20 = arith.maximumf %18, %19 : vector<256x128xf32>
      %21 = arith.truncf %20 : vector<256x128xf32> to vector<256x128xbf16>
      %c0_18 = arith.constant 0 : index
      %c0_19 = arith.constant 0 : index
      %22 = vector.load %arg6[%c0_18, %c0_19] : memref<256x128xbf16, #tpu.memory_space<vmem>>, vector<256x128xbf16>
      tpu.vector_store %arg6[%c0_18, %c0_19], %21 {strides = array<i32>} : memref<256x128xbf16, #tpu.memory_space<vmem>>, vector<256x128xbf16>,
    } else {
    }
    return
  }
  func.func @transform_0(%arg0: i32, %arg1: i32) -> (i32, i32) {
    %c0_i32 = arith.constant 0 : i32
    return %arg0, %arg1 : i32, i32
  }
  func.func @transform_1(%arg0: i32, %arg1: i32) -> (i32, i32) {
    %c0_i32 = arith.constant 0 : i32
    %c0_i32_0 = arith.constant 0 : i32
    return %arg1, %c0_i32 : i32, i32
  }
  func.func @transform_2(%arg0: i32, %arg1: i32) -> (i32, i32) {
    %c0_i32 = arith.constant 0 : i32
    %c0_i32_0 = arith.constant 0 : i32
    %c0_i32_1 = arith.constant 0 : i32
    return %c0_i32, %c0_i32_0 : i32, i32
  }
  func.func @transform_3(%arg0: i32, %arg1: i32) -> (i32, i32) {
    %c0_i32 = arith.constant 0 : i32
    %c0_i32_0 = arith.constant 0 : i32
    %c0_i32_1 = arith.constant 0 : i32
    return %c0_i32, %c0_i32_0 : i32, i32
  }
  func.func @transform_4(%arg0: i32, %arg1: i32) -> (i32, i32) {
    %c0_i32 = arith.constant 0 : i32
    %c0_i32_0 = arith.constant 0 : i32
    return %arg0, %c0_i32 : i32, i32
  }
}

module attributes {stable_mosaic.version = 11 : i64} {
  func.func @gcn_conv_premm_kernel(%arg0: i32, %arg1: i32, %arg2: memref<256x256xbf16, #tpu.memory_space<vmem>>, %arg3: memref<256x128xbf16, #tpu.memory_space<vmem>>, %arg4: memref<1x128xf32, #tpu.memory_space<vmem>>, %arg5: memref<256x128xf32, #tpu.memory_space<vmem>>) attributes {dimension_semantics = [#tpu.dimension_semantics<parallel>, #tpu.dimension_semantics<arbitrary>], iteration_bounds = array<i64: 1, 1>, scalar_prefetch = 0 : i64, scratch_operands = 0 : i64, tpu.core_type = #tpu.core_type<tc>, window_params = [{transform_indices = @transform_0, window_bounds = array<i64: 256, 256>}, {transform_indices = @transform_1, window_bounds = array<i64: 256, 128>}, {pipeline_mode = #tpu.pipeline_mode<synchronous>, transform_indices = @transform_2, window_bounds = array<i64: 1, 128>}, {transform_indices = @transform_3, window_bounds = array<i64: 256, 128>}]} {
    %c0_i32 = arith.constant 0 : i32
    %0 = arith.cmpi eq, %arg1, %c0_i32 : i32
    %1 = arith.extui %0 : i1 to i32
    %c0_i32_0 = arith.constant 0 : i32
    %2 = arith.cmpi ne, %1, %c0_i32_0 : i32
    scf.if %2 {
      %cst_10 = arith.constant 0.000000e+00 : f32
      %12 = vector.broadcast %cst_10 : f32 to vector<256x128xf32>
      %c0_11 = arith.constant 0 : index
      %c0_12 = arith.constant 0 : index
      %13 = vector.load %arg5[%c0_11, %c0_12] : memref<256x128xf32, #tpu.memory_space<vmem>>, vector<256x128xf32>
      tpu.vector_store %arg5[%c0_11, %c0_12], %12 {strides = array<i32>} : memref<256x128xf32, #tpu.memory_space<vmem>>, vector<256x128xf32>,
    } else {
    }
    %c0 = arith.constant 0 : index
    %c0_1 = arith.constant 0 : index
    %3 = vector.load %arg5[%c0, %c0_1] : memref<256x128xf32, #tpu.memory_space<vmem>>, vector<256x128xf32>
    %c0_2 = arith.constant 0 : index
    %c0_3 = arith.constant 0 : index
    %4 = vector.load %arg2[%c0_2, %c0_3] : memref<256x256xbf16, #tpu.memory_space<vmem>>, vector<256x256xbf16>
    %c0_4 = arith.constant 0 : index
    %c0_5 = arith.constant 0 : index
    %5 = vector.load %arg3[%c0_4, %c0_5] : memref<256x128xbf16, #tpu.memory_space<vmem>>, vector<256x128xbf16>
    %cst = arith.constant dense<0.000000e+00> : vector<256x128xf32>
    %6 = tpu.matmul %4, %5, %cst {dimension_numbers = #tpu.dot_dimension_numbers<[1], [0], [0], [1], [0, 0, 1, 1], [], []>} : vector<256x256xbf16>, vector<256x128xbf16>, vector<256x128xf32> -> vector<256x128xf32>
    %7 = arith.addf %3, %6 : vector<256x128xf32>
    %c0_6 = arith.constant 0 : index
    %c0_7 = arith.constant 0 : index
    %8 = vector.load %arg5[%c0_6, %c0_7] : memref<256x128xf32, #tpu.memory_space<vmem>>, vector<256x128xf32>
    tpu.vector_store %arg5[%c0_6, %c0_7], %7 {strides = array<i32>} : memref<256x128xf32, #tpu.memory_space<vmem>>, vector<256x128xf32>,
    %c0_i32_8 = arith.constant 0 : i32
    %9 = arith.cmpi eq, %arg1, %c0_i32_8 : i32
    %10 = arith.extui %9 : i1 to i32
    %c0_i32_9 = arith.constant 0 : i32
    %11 = arith.cmpi ne, %10, %c0_i32_9 : i32
    scf.if %11 {
      %c0_10 = arith.constant 0 : index
      %c0_11 = arith.constant 0 : index
      %12 = vector.load %arg5[%c0_10, %c0_11] : memref<256x128xf32, #tpu.memory_space<vmem>>, vector<256x128xf32>
      %c0_12 = arith.constant 0 : index
      %c0_13 = arith.constant 0 : index
      %13 = vector.load %arg4[%c0_12, %c0_13] : memref<1x128xf32, #tpu.memory_space<vmem>>, vector<1x128xf32>
      %14 = vector.broadcast %13 : vector<1x128xf32> to vector<256x128xf32>
      %15 = arith.addf %12, %14 : vector<256x128xf32>
      %16 = tpu.iota {dimensions = array<i32: 1>} : vector<256x128xi32>
      %c8_i32 = arith.constant 8 : i32
      %17 = vector.broadcast %c8_i32 : i32 to vector<256x128xi32>
      %18 = arith.cmpi slt, %16, %17 : vector<256x128xi32>
      %cst_14 = arith.constant -1.000000e+30 : f32
      %19 = vector.broadcast %cst_14 : f32 to vector<256x128xf32>
      %20 = arith.select %18, %15, %19 : vector<256x128xi1>, vector<256x128xf32>
      %cst_15 = arith.constant dense<0xFF800000> : vector<256xf32>
      %21 = vector.multi_reduction <maximumf>, %20, %cst_15 [1] : vector<256x128xf32> to vector<256xf32>
      %22 = vector.shape_cast %21 : vector<256xf32> to vector<256x1xf32>
      %23 = vector.broadcast %22 : vector<256x1xf32> to vector<256x128xf32>
      %24 = arith.subf %20, %23 : vector<256x128xf32>
      %25 = math.exp %24 : vector<256x128xf32>
      %cst_16 = arith.constant dense<0.000000e+00> : vector<256xf32>
      %26 = vector.multi_reduction <add>, %25, %cst_16 [1] : vector<256x128xf32> to vector<256xf32>
      %27 = vector.shape_cast %26 : vector<256xf32> to vector<256x1xf32>
      %28 = math.log %27 : vector<256x1xf32>
      %29 = vector.broadcast %28 : vector<256x1xf32> to vector<256x128xf32>
      %30 = arith.subf %24, %29 : vector<256x128xf32>
      %c0_17 = arith.constant 0 : index
      %c0_18 = arith.constant 0 : index
      %31 = vector.load %arg5[%c0_17, %c0_18] : memref<256x128xf32, #tpu.memory_space<vmem>>, vector<256x128xf32>
      tpu.vector_store %arg5[%c0_17, %c0_18], %30 {strides = array<i32>} : memref<256x128xf32, #tpu.memory_space<vmem>>, vector<256x128xf32>,
    } else {
    }
    return
  }
  func.func @transform_0(%arg0: i32, %arg1: i32) -> (i32, i32) {
    %c0_i32 = arith.constant 0 : i32
    return %arg0, %arg1 : i32, i32
  }
  func.func @transform_1(%arg0: i32, %arg1: i32) -> (i32, i32) {
    %c0_i32 = arith.constant 0 : i32
    %c0_i32_0 = arith.constant 0 : i32
    return %arg1, %c0_i32 : i32, i32
  }
  func.func @transform_2(%arg0: i32, %arg1: i32) -> (i32, i32) {
    %c0_i32 = arith.constant 0 : i32
    %c0_i32_0 = arith.constant 0 : i32
    %c0_i32_1 = arith.constant 0 : i32
    return %c0_i32, %c0_i32_0 : i32, i32
  }
  func.func @transform_3(%arg0: i32, %arg1: i32) -> (i32, i32) {
    %c0_i32 = arith.constant 0 : i32
    %c0_i32_0 = arith.constant 0 : i32
    return %arg0, %c0_i32 : i32, i32
  }
}

</mosaic_0001>

<bundles_post_ra>
// kernel: gcn_forward.2
= control target key start
LH: loop header
LB: loop body
LE: loop exit
PB: predicated region body
PF: predicated region fallthrough
CT: control target
= control target key end

     0   :  { %vm182_vm0 = vcmask 261120   ;;  %s1749_s2 = inlined_call_operand.vmem [shape: bf16[32,128], index: 2, kind: input, shape index: {}]   ;;  %s1750_s1 = inlined_call_operand.vmem [shape: bf16[256,32], index: 1, kind: input, shape index: {}]   ;;  %s1751_s0 = inlined_call_operand.vmem [shape: bf16[256,256], index: 0, kind: input, shape index: {}]   ;;  %s1752_s3 = inlined_call_operand.vmem [shape: f32[1,128], index: 3, kind: input, shape index: {}]   ;;  %s1753_s4 = inlined_call_operand.vmem [shape: bf16[256,128], index: 4, kind: output, shape index: {}]  }
   0x1   :  { %v1206_v0 = vld [vmem:[%s1749_s2 + $0x8] sm:$0xff]  ;;  %v1205_v1 = vld [vmem:[%s1749_s2] sm:$0xff]  ;;  %v1191_v4 = vld [vmem:[%s1750_s1 + $0x10] sm:$0xff] }
   0x2   :  { %237 = vmatpush.bf16.msra.mxu0 %v1206_v0  ;;  %1334 = vmatpush.bf16.msra.mxu3 %v1206_v0  ;;  %v1189_v2 = vld [vmem:[%s1750_s1] sm:$0xff]  ;;  %v1190_v3 = vld [vmem:[%s1750_s1 + $0x8] sm:$0xff]  ;;  %v1192_v5 = vld [vmem:[%s1750_s1 + $0x18] sm:$0xff] }
   0x3   :  { %v1202_v6 = vld [vmem:[%s1750_s1 + $0x68] sm:$0xff]  ;;  %v1193_v7 = vld [vmem:[%s1750_s1 + $0x20] sm:$0xff]  ;;  %v1203_v8 = vld [vmem:[%s1750_s1 + $0x70] sm:$0xff] }
   0x4   :  { %v1194_v9 = vld [vmem:[%s1750_s1 + $0x28] sm:$0xff]  ;;  %v1195_v10 = vld [vmem:[%s1750_s1 + $0x30] sm:$0xff]  ;;  %v1204_v11 = vld [vmem:[%s1750_s1 + $0x78] sm:$0xff] }
   0x5   :  { %v1196_v12 = vld [vmem:[%s1750_s1 + $0x38] sm:$0xff]  ;;  %v1197_v13 = vld [vmem:[%s1750_s1 + $0x40] sm:$0xff]  ;;  %v1198_v17 = vld [vmem:[%s1750_s1 + $0x48] sm:$0xff] }
   0x6   :  { %238 = vmatpush.bf16.msra.mxu0 %v1205_v1  ;;  %1335 = vmatpush.bf16.msra.mxu3 %v1205_v1  ;;  %v1199_v21 = vld [vmem:[%s1750_s1 + $0x50] sm:$0xff]  ;;  %v1200_v25 = vld [vmem:[%s1750_s1 + $0x58] sm:$0xff]  ;;  %v1201_v29 = vld [vmem:[%s1750_s1 + $0x60] sm:$0xff] }
   0x7   :  { %v1159_v59 = vld [vmem:[%s1751_s0 + $0xc0] sm:$0xf]  ;;  %v1232_v60 = vld [vmem:[%s1751_s0 + $0xc4] sm:$0xf0] }
   0x8   :  { %v1160_v61 = vor.u32 %v1232_v60, %v1159_v59  ;;  %v1063_v63 = vld [vmem:[%s1751_s0] sm:$0xf]  ;;  %v1208_v0 = vld [vmem:[%s1751_s0 + $0x4] sm:$0xf0]  ;;  %v1237_v59 = vld [vmem:[%s1751_s0 + $0xf4] sm:$0xf] }
   0x9   :  { %1045 = vmatmul.msk.bf16.vlgmr.msra.gmra.mxu0 %vm182_vm0, %v1189_v2  ;;  %1058 = vmatmul.msk.bf16.vlgmr.msra.gmra.mxu3 %vm182_vm0, %v1202_v6  ;;  %v1064_v1 = vor.u32 %v1208_v0, %v1063_v63  ;;  %v1167_v2 = vld [vmem:[%s1751_s0 + $0xd0] sm:$0xf]  ;;  %v1185_v60 = vld [vmem:[%s1751_s0 + $0xf8] sm:$0xf0]  ;;  %v1222_v63 = vld [vmem:[%s1751_s0 + $0x74] sm:$0xf0] }
   0xa   :  { %v1071_v6 = vld [vmem:[%s1751_s0 + $0x10] sm:$0xf]  ;;  %v1217_v0 = vld [vmem:[%s1751_s0 + $0x54] sm:$0xf] }
  0x19   :  { %1046 = vmatmul.msk.bf16.gmra.mxu0 %vm182_vm0, %v1190_v3  ;;  %1059 = vmatmul.msk.bf16.gmra.mxu3 %vm182_vm0, %v1203_v8  ;;  %v1234_v3 = vld [vmem:[%s1751_s0 + $0xd4] sm:$0xf0] }
  0x29   :  { %1047 = vmatmul.msk.bf16.gmra.mxu0 %vm182_vm0, %v1191_v4  ;;  %1060 = vmatmul.msk.bf16.gmra.mxu3 %vm182_vm0, %v1204_v11 }
  0x39   :  { %1048 = vmatmul.msk.bf16.gmra.mxu0 %vm182_vm0, %v1192_v5  ;;  %v1168_v5 = vor.u32 %v1234_v3, %v1167_v2 }
  0x49   :  { %1049 = vmatmul.msk.bf16.gmra.mxu0 %vm182_vm0, %v1193_v7  ;;  %v1210_v7 = vld [vmem:[%s1751_s0 + $0x14] sm:$0xf0] }
  0x59   :  { %1050 = vmatmul.msk.bf16.gmra.mxu0 %vm182_vm0, %v1194_v9  ;;  %v1072_v9 = vor.u32 %v1210_v7, %v1071_v6  ;;  %v1219_v6 = vld [vmem:[%s1751_s0 + $0x64] sm:$0xf]  ;;  %v1113_v7 = vld [vmem:[%s1751_s0 + $0x68] sm:$0xf0] }
  0x69   :  { %1051 = vmatmul.msk.bf16.gmra.mxu0 %vm182_vm0, %v1195_v10 }
  0x79   :  { %1052 = vmatmul.msk.bf16.gmra.mxu0 %vm182_vm0, %v1196_v12  ;;  %v1175_v12 = vld [vmem:[%s1751_s0 + $0xe0] sm:$0xf] }
  0x86   :  { %v240_v14 = vpop.f32.mrf.mxu0 }
  0x89   :  { %1053 = vmatmul.msk.bf16.gmra.mxu0 %vm182_vm0, %v1197_v13  ;;  %v1236_v13 = vld [vmem:[%s1751_s0 + $0xe4] sm:$0xf0] }
  0x8c   :  { %v305_v31 = vpop.f32.mrf.mxu3 }
  0x8e   :  { %v242_v15 = vpop.f32.mrf.mxu0 }
  0x8f   :  { %v384_v16 = vpack.c.bf16 %v242_v15, %v240_v14  ;;  %v1176_v15 = vor.u32 %v1236_v13, %v1175_v12 }
  0x94   :  { %v307_v33 = vpop.f32.mrf.mxu3 }
  0x95   :  { %v397_v45 = vpack.c.bf16 %v307_v33, %v305_v31  ;;  %v1161_v33 = vld [vmem:[%s1751_s0 + $0xc8] sm:$0xf0] }
  0x96   :  { %v245_v18 = vpop.f32.mrf.mxu0 }
  0x99   :  { %1054 = vmatmul.msk.bf16.gmra.mxu0 %vm182_vm0, %v1198_v17  ;;  %v1079_v17 = vld [vmem:[%s1751_s0 + $0x20] sm:$0xf] }
  0x9c   :  { %v310_v35 = vpop.f32.mrf.mxu3 }
  0x9e   :  { %v247_v19 = vpop.f32.mrf.mxu0 }
  0x9f   :  { %v385_v20 = vpack.c.bf16 %v247_v19, %v245_v18  ;;  %v1212_v18 = vld [vmem:[%s1751_s0 + $0x24] sm:$0xf0]  ;;  %v1207_v19 = vld [vmem:[%s1751_s0 + $0x4] sm:$0xf] }
  0xa4   :  { %v312_v37 = vpop.f32.mrf.mxu3 }
  0xa5   :  { %v398_v43 = vpack.c.bf16 %v312_v37, %v310_v35  ;;  %v1095_v35 = vld [vmem:[%s1751_s0 + $0x40] sm:$0xf]  ;;  %v1211_v37 = vld [vmem:[%s1751_s0 + $0x24] sm:$0xf] }
  0xa6   :  { %v250_v22 = vpop.f32.mrf.mxu0 }
  0xa9   :  { %1055 = vmatmul.msk.bf16.gmra.mxu0 %vm182_vm0, %v1199_v21  ;;  %v1080_v21 = vor.u32 %v1212_v18, %v1079_v17  ;;  %v1135_v18 = vld [vmem:[%s1751_s0 + $0x90] sm:$0xf] }
  0xac   :  { %v315_v39 = vpop.f32.mrf.mxu3 }
  0xae   :  { %v252_v23 = vpop.f32.mrf.mxu0 }
  0xaf   :  { %v386_v24 = vpack.c.bf16 %v252_v23, %v250_v22  ;;  %v1183_v23 = vld [vmem:[%s1751_s0 + $0xf0] sm:$0xf] }
  0xb4   :  { %v317_v41 = vpop.f32.mrf.mxu3 }
  0xb5   :  { %v399_v42 = vpack.c.bf16 %v317_v41, %v315_v39  ;;  %v1233_v41 = vld [vmem:[%s1751_s0 + $0xd4] sm:$0xf] }
  0xb6   :  { %v255_v26 = vpop.f32.mrf.mxu0 }
  0xb7   :  { %649 = vmatpush.bf16.msra.mxu2 %v399_v42 }
  0xb9   :  { %1056 = vmatmul.msk.bf16.gmra.mxu0 %vm182_vm0, %v1200_v25 }
  0xbb   :  { %650 = vmatpush.bf16.msra.mxu2 %v398_v43 }
  0xbe   :  { %v257_v27 = vpop.f32.mrf.mxu0 }
  0xbf   :  { %v387_v28 = vpack.c.bf16 %v257_v27, %v255_v26  ;;  %651 = vmatpush.bf16.msra.mxu2 %v397_v45  ;;  %v1087_v26 = vld [vmem:[%s1751_s0 + $0x30] sm:$0xf]  ;;  %v1214_v27 = vld [vmem:[%s1751_s0 + $0x34] sm:$0xf0] }
  0xc6   :  { %v260_v30 = vpop.f32.mrf.mxu0 }
  0xc9   :  { %1057 = vmatmul.msk.bf16.gmra.mxu0 %vm182_vm0, %v1201_v29  ;;  %v1073_v29 = vld [vmem:[%s1751_s0 + $0x18] sm:$0xf0] }
  0xce   :  { %v262_v32 = vpop.f32.mrf.mxu0 }
  0xcf   :  { %v388_v51 = vpack.c.bf16 %v262_v32, %v260_v30  ;;  %v1088_v30 = vor.u32 %v1214_v27, %v1087_v26  ;;  %v1231_v32 = vld [vmem:[%s1751_s0 + $0xc4] sm:$0xf]  ;;  %v1143_v27 = vld [vmem:[%s1751_s0 + $0xa0] sm:$0xf] }
  0xd6   :  { %v265_v34 = vpop.f32.mrf.mxu0 }
  0xde   :  { %v267_v36 = vpop.f32.mrf.mxu0 }
  0xdf   :  { %v389_v50 = vpack.c.bf16 %v267_v36, %v265_v34  ;;  %v1164_v34 = vor.u32 %v1231_v32, %v1161_v33  ;;  %v1216_v36 = vld [vmem:[%s1751_s0 + $0x44] sm:$0xf0] }
  0xe0   :  { %v1096_v39 = vor.u32 %v1216_v36, %v1095_v35  ;;  %v1631_v36 = vld [vmem:[%s1752_s3] ss:$0 sm:$0xff] }
  0xe6   :  { %v270_v38 = vpop.f32.mrf.mxu0 }
  0xee   :  { %v272_v40 = vpop.f32.mrf.mxu0 }
  0xef   :  { %v390_v48 = vpack.c.bf16 %v272_v40, %v270_v38  ;;  %v1081_v38 = vld [vmem:[%s1751_s0 + $0x28] sm:$0xf0] }
  0xf0   :  { %v1084_v40 = vor.u32 %v1211_v37, %v1081_v38  ;;  %v1225_v37 = vld [vmem:[%s1751_s0 + $0x94] sm:$0xf]  ;;  %v1137_v38 = vld [vmem:[%s1751_s0 + $0x98] sm:$0xf0] }
  0xf6   :  { %v275_v44 = vpop.f32.mrf.mxu0 }
  0xfe   :  { %v277_v46 = vpop.f32.mrf.mxu0 }
  0xff   :  { %v391_v47 = vpack.c.bf16 %v277_v46, %v275_v44  ;;  %v1103_v44 = vld [vmem:[%s1751_s0 + $0x50] sm:$0xf]  ;;  %v1213_v46 = vld [vmem:[%s1751_s0 + $0x34] sm:$0xf] }
 0x101   :  { %560 = vmatpush.bf16.msra.mxu1 %v391_v47  ;;  %1336 = vmatpush.bf16.msrb.mxu3 %v391_v47  ;;  %v1089_v47 = vld [vmem:[%s1751_s0 + $0x38] sm:$0xf0] }
 0x105   :  { %561 = vmatpush.bf16.msra.mxu1 %v390_v48  ;;  %1337 = vmatpush.bf16.msrb.mxu3 %v390_v48 }
 0x106   :  { %v280_v49 = vpop.f32.mrf.mxu0 }
 0x109   :  { %562 = vmatpush.bf16.msra.mxu1 %v389_v50  ;;  %1338 = vmatpush.bf16.msrb.mxu3 %v389_v50  ;;  %v1235_v50 = vld [vmem:[%s1751_s0 + $0xe4] sm:$0xf] }
 0x10d   :  { %563 = vmatpush.bf16.msra.mxu1 %v388_v51  ;;  %1339 = vmatpush.bf16.msrb.mxu3 %v388_v51  ;;  %v1177_v51 = vld [vmem:[%s1751_s0 + $0xe8] sm:$0xf0] }
 0x10e   :  { %v282_v52 = vpop.f32.mrf.mxu0 }
 0x10f   :  { %v392_v53 = vpack.c.bf16 %v282_v52, %v280_v49  ;;  %v1092_v49 = vor.u32 %v1213_v46, %v1089_v47  ;;  %v1180_v52 = vor.u32 %v1235_v50, %v1177_v51 }
 0x111   :  { %564 = vmatpush.bf16.msra.mxu1 %v387_v28  ;;  %1340 = vmatpush.bf16.msrb.mxu3 %v387_v28  ;;  %v1209_v28 = vld [vmem:[%s1751_s0 + $0x14] sm:$0xf] }
 0x112   :  { %v1076_v31 = vor.u32 %v1209_v28, %v1073_v29  ;;  %v1228_v28 = vld [vmem:[%s1751_s0 + $0xa4] sm:$0xf0] }
 0x115   :  { %565 = vmatpush.bf16.msra.mxu1 %v386_v24  ;;  %1341 = vmatpush.bf16.msrb.mxu3 %v386_v24  ;;  %v1238_v24 = vld [vmem:[%s1751_s0 + $0xf4] sm:$0xf0] }
 0x116   :  { %v285_v54 = vpop.f32.mrf.mxu0  ;;  %v1184_v25 = vor.u32 %v1238_v24, %v1183_v23  ;;  %v1223_v24 = vld [vmem:[%s1751_s0 + $0x84] sm:$0xf] }
 0x119   :  { %566 = vmatpush.bf16.msra.mxu1 %v385_v20  ;;  %1342 = vmatpush.bf16.msrb.mxu3 %v385_v20  ;;  %v1065_v20 = vld [vmem:[%s1751_s0 + $0x8] sm:$0xf0] }
 0x11a   :  { %v1068_v22 = vor.u32 %v1207_v19, %v1065_v20  ;;  %v1226_v19 = vld [vmem:[%s1751_s0 + $0x94] sm:$0xf0] }
 0x11d   :  { %567 = vmatpush.bf16.msra.mxu1 %v384_v16  ;;  %1343 = vmatpush.bf16.msrb.mxu3 %v384_v16 }
 0x11e   :  { %v287_v55 = vpop.f32.mrf.mxu0 }
 0x11f   :  { %v393_v16 = vpack.c.bf16 %v287_v55, %v285_v54  ;;  %v1220_v54 = vld [vmem:[%s1751_s0 + $0x64] sm:$0xf0]  ;;  %v1215_v55 = vld [vmem:[%s1751_s0 + $0x44] sm:$0xf] }
 0x120   :  { %628 = vmatmul.bf16.vlgmr.msrb.gmra.mxu3 %v1160_v61  ;;  %568 = vmatmul.bf16.vlgmr.msra.gmra.mxu1 %v1064_v1  ;;  %v1188_v61 = vor.u32 %v1237_v59, %v1185_v60  ;;  %v1105_v1 = vld [vmem:[%s1751_s0 + $0x58] sm:$0xf0] }
 0x121   :  { %1344 = vmatpush.bf16.msra.mxu3 %v399_v42  ;;  %v1169_v42 = vld [vmem:[%s1751_s0 + $0xd8] sm:$0xf0]  ;;  %v1108_v3 = vor.u32 %v1217_v0, %v1105_v1 }
 0x125   :  { %1345 = vmatpush.bf16.msra.mxu3 %v398_v43  ;;  %v1172_v43 = vor.u32 %v1233_v41, %v1169_v42  ;;  %v1230_v41 = vld [vmem:[%s1751_s0 + $0xb4] sm:$0xf0] }
 0x126   :  { %v290_v56 = vpop.f32.mrf.mxu0 }
 0x129   :  { %1346 = vmatpush.bf16.msra.mxu3 %v397_v45  ;;  %v1218_v45 = vld [vmem:[%s1751_s0 + $0x54] sm:$0xf0] }
 0x12a   :  { %v1104_v48 = vor.u32 %v1218_v45, %v1103_v44  ;;  %v1140_v44 = vor.u32 %v1225_v37, %v1137_v38 }
 0x12e   :  { %v292_v57 = vpop.f32.mrf.mxu0 }
 0x12f   :  { %v394_v14 = vpack.c.bf16 %v292_v57, %v290_v56  ;;  %v1097_v56 = vld [vmem:[%s1751_s0 + $0x48] sm:$0xf0] }
 0x130   :  { %633 = vmatmul.bf16.gmra.mxu3 %v1168_v5  ;;  %573 = vmatmul.bf16.gmra.mxu1 %v1072_v9  ;;  %v1224_v5 = vld [vmem:[%s1751_s0 + $0x84] sm:$0xf0] }
 0x136   :  { %v295_v58 = vpop.f32.mrf.mxu0 }
 0x13e   :  { %v297_v62 = vpop.f32.mrf.mxu0 }
 0x13f   :  { %v395_v11 = vpack.c.bf16 %v297_v62, %v295_v58  ;;  %v1100_v58 = vor.u32 %v1215_v55, %v1097_v56  ;;  %v1119_v62 = vld [vmem:[%s1751_s0 + $0x70] sm:$0xf]  ;;  %v1227_v55 = vld [vmem:[%s1751_s0 + $0xa4] sm:$0xf]  ;;  %v1145_v56 = vld [vmem:[%s1751_s0 + $0xa8] sm:$0xf0] }
 0x140   :  { %638 = vmatmul.bf16.gmra.mxu3 %v1176_v15  ;;  %578 = vmatmul.bf16.gmra.mxu1 %v1080_v21  ;;  %v1120_v2 = vor.u32 %v1222_v63, %v1119_v62  ;;  %v1121_v15 = vld [vmem:[%s1751_s0 + $0x78] sm:$0xf0]  ;;  %v1136_v21 = vor.u32 %v1226_v19, %v1135_v18 }
 0x146   :  { %v300_v4 = vpop.f32.mrf.mxu0 }
 0x14e   :  { %v302_v8 = vpop.f32.mrf.mxu0 }
 0x14f   :  { %v396_v10 = vpack.c.bf16 %v302_v8, %v300_v4  ;;  %v1127_v4 = vld [vmem:[%s1751_s0 + $0x80] sm:$0xf] }
 0x150   :  { %643 = vmatmul.bf16.gmra.mxu3 %v1184_v25  ;;  %583 = vmatmul.bf16.gmra.mxu1 %v1088_v30  ;;  %v1128_v8 = vor.u32 %v1224_v5, %v1127_v4  ;;  %v1129_v25 = vld [vmem:[%s1751_s0 + $0x88] sm:$0xf0]  ;;  %v1144_v30 = vor.u32 %v1228_v28, %v1143_v27 }
 0x151   :  { %652 = vmatpush.bf16.msra.mxu2 %v396_v10  ;;  %1347 = vmatpush.bf16.msra.mxu3 %v396_v10  ;;  %v1132_v29 = vor.u32 %v1223_v24, %v1129_v25 }
 0x155   :  { %653 = vmatpush.bf16.msra.mxu2 %v395_v11  ;;  %1348 = vmatpush.bf16.msra.mxu3 %v395_v11  ;;  %v1116_v11 = vor.u32 %v1219_v6, %v1113_v7 }
 0x159   :  { %654 = vmatpush.bf16.msra.mxu2 %v394_v14  ;;  %1349 = vmatpush.bf16.msra.mxu3 %v394_v14  ;;  %v1221_v14 = vld [vmem:[%s1751_s0 + $0x74] sm:$0xf] }
 0x15a   :  { %v1124_v20 = vor.u32 %v1221_v14, %v1121_v15  ;;  %v1229_v14 = vld [vmem:[%s1751_s0 + $0xb4] sm:$0xf]  ;;  %v1153_v15 = vld [vmem:[%s1751_s0 + $0xb8] sm:$0xf0] }
 0x15d   :  { %655 = vmatpush.bf16.msra.mxu2 %v393_v16  ;;  %1350 = vmatpush.bf16.msra.mxu3 %v393_v16 }
 0x160   :  { %588 = vmatmul.bf16.gmra.mxu1 %v1096_v39 }
 0x161   :  { %656 = vmatpush.bf16.msra.mxu2 %v392_v53  ;;  %1351 = vmatpush.bf16.msra.mxu3 %v392_v53  ;;  %v1111_v53 = vld [vmem:[%s1751_s0 + $0x60] sm:$0xf] }
 0x162   :  { %v1112_v57 = vor.u32 %v1220_v54, %v1111_v53 }
 0x164   :  { %657 = vmatmul.bf16.vlgmr.msra.gmra.mxu2 %v1068_v22  ;;  %717 = vmatmul.bf16.vlgmr.msra.gmra.mxu3 %v1164_v34 }
 0x170   :  { %593 = vmatmul.bf16.gmra.mxu1 %v1104_v48 }
 0x174   :  { %662 = vmatmul.bf16.gmra.mxu2 %v1076_v31  ;;  %722 = vmatmul.bf16.gmra.mxu3 %v1172_v43 }
 0x180   :  { %598 = vmatmul.bf16.gmra.mxu1 %v1112_v57 }
 0x184   :  { %667 = vmatmul.bf16.gmra.mxu2 %v1084_v40  ;;  %727 = vmatmul.bf16.gmra.mxu3 %v1180_v52  ;;  %v1151_v40 = vld [vmem:[%s1751_s0 + $0xb0] sm:$0xf] }
 0x185   :  { %v1152_v46 = vor.u32 %v1230_v41, %v1151_v40 }
 0x190   :  { %603 = vmatmul.bf16.gmra.mxu1 %v1120_v2 }
 0x194   :  { %672 = vmatmul.bf16.gmra.mxu2 %v1092_v49  ;;  %732 = vmatmul.bf16.gmra.mxu3 %v1188_v61  ;;  %v1148_v61 = vor.u32 %v1227_v55, %v1145_v56 }
 0x19d   :  { %v569_v9 = vpop.f32.mrf.mxu1 }
 0x1a0   :  { %608 = vmatmul.bf16.gmra.mxu1 %v1128_v8 }
 0x1a3   :  { %v1592_v10 = vpop.f32.mrf.mxu3 }
 0x1a4   :  { %677 = vmatmul.bf16.gmra.mxu2 %v1100_v58 }
 0x1a5   :  { %v571_v12 = vpop.f32.mrf.mxu1 }
 0x1ab   :  { %v1594_v13 = vpop.f32.mrf.mxu3 }
 0x1ad   :  { %v574_v16 = vpop.f32.mrf.mxu1 }
 0x1b0   :  { %613 = vmatmul.bf16.gmra.mxu1 %v1136_v21 }
 0x1b3   :  { %v1602_v17 = vpop.f32.mrf.mxu3 }
 0x1b4   :  { %682 = vmatmul.bf16.gmra.mxu2 %v1108_v3 }
 0x1b5   :  { %v576_v22 = vpop.f32.mrf.mxu1 }
 0x1bb   :  { %v1610_v23 = vpop.f32.mrf.mxu3 }
 0x1bd   :  { %v579_v31 = vpop.f32.mrf.mxu1 }
 0x1c0   :  { %618 = vmatmul.bf16.gmra.mxu1 %v1144_v30 }
 0x1c3   :  { %v1618_v26 = vpop.f32.mrf.mxu3 }
 0x1c4   :  { %687 = vmatmul.bf16.gmra.mxu2 %v1116_v11 }
 0x1c5   :  { %v581_v34 = vpop.f32.mrf.mxu1 }
 0x1cb   :  { %v1626_v33 = vpop.f32.mrf.mxu3 }
 0x1cd   :  { %v584_v50 = vpop.f32.mrf.mxu1 }
 0x1d0   :  { %623 = vmatmul.bf16.gmra.mxu1 %v1152_v46 }
 0x1d3   :  { %v1646_v45 = vpop.f32.mrf.mxu3 }
 0x1d4   :  { %692 = vmatmul.bf16.gmra.mxu2 %v1124_v20  ;;  %v1156_v20 = vor.u32 %v1229_v14, %v1153_v15 }
 0x1d5   :  { %v586_v58 = vpop.f32.mrf.mxu1 }
 0x1db   :  { %v1652_v53 = vpop.f32.mrf.mxu3 }
 0x1dd   :  { %v589_v6 = vpop.f32.mrf.mxu1 }
 0x1e4   :  { %697 = vmatmul.bf16.gmra.mxu2 %v1132_v29 }
 0x1e5   :  { %v591_v24 = vpop.f32.mrf.mxu1 }
 0x1e7   :  { %v658_v32 = vpop.f32.mrf.mxu2  ;;  %v718_v62 = vpop.f32.mrf.mxu3 }
 0x1e8   :  { %v659_v35 = vadd.f32 %v658_v32, %v569_v9  ;;  %v719_v4 = vadd.f32 %v718_v62, %v1592_v10 }
 0x1ea   :  { %v841_v42 = vadd.f32 %v1631_v36, %v659_v35  ;;  %v865_v8 = vadd.f32 %v1631_v36, %v719_v4 }
 0x1ec   :  { %v873_v48 = vmax.f32 %v841_v42, 0.0 }
 0x1ef   :  { %v660_v39 = vpop.f32.mrf.mxu2  ;;  %v720_v5 = vpop.f32.mrf.mxu3 }
 0x1f0   :  { %v661_v43 = vadd.f32 %v660_v39, %v571_v12  ;;  %v721_v7 = vadd.f32 %v720_v5, %v1594_v13  ;;  %v897_v12 = vmax.f32 %v865_v8, 0.0  ;;  %v594_v39 = vpop.f32.mrf.mxu1 }
 0x1f2   :  { %v842_v47 = vadd.f32 %v1631_v36, %v661_v43  ;;  %v866_v9 = vadd.f32 %v1631_v36, %v721_v7 }
 0x1f4   :  { %v874_v49 = vmax.f32 %v842_v47, 0.0  ;;  %702 = vmatmul.bf16.gmra.mxu2 %v1140_v44 }
 0x1f6   :  { %v1242_v51 = vpack.c.bf16 %v874_v49, %v873_v48 }
 0x1f7   :  { %v663_v52 = vpop.f32.mrf.mxu2  ;;  %v723_v21 = vpop.f32.mrf.mxu3 }
 0x1f8   :  { %1243 = vst [vmem:[%s1753_s4] sm:$0xff] %v1242_v51   ;;  %v664_v54 = vadd.f32 %v663_v52, %v574_v16  ;;  %v898_v16 = vmax.f32 %v866_v9, 0.0  ;;  %v724_v30 = vadd.f32 %v723_v21, %v1602_v17 }
 0x1fa   :  { %v843_v59 = vadd.f32 %v1631_v36, %v664_v54  ;;  %v1302_v18 = vpack.c.bf16 %v898_v16, %v897_v12 }
 0x1fc   :  { %v875_v0 = vmax.f32 %v843_v59, 0.0  ;;  %1330 = vst [vmem:[%s1753_s4 + $0x60] sm:$0xff] %v1302_v18  }
 0x1ff   :  { %v665_v57 = vpop.f32.mrf.mxu2 }
 0x200   :  { %v666_v60 = vadd.f32 %v665_v57, %v576_v22 }
 0x202   :  { %v844_v63 = vadd.f32 %v1631_v36, %v666_v60 }
 0x204   :  { %v876_v1 = vmax.f32 %v844_v63, 0.0  ;;  %707 = vmatmul.bf16.gmra.mxu2 %v1148_v61 }
 0x206   :  { %v1247_v2 = vpack.c.bf16 %v876_v1, %v875_v0 }
 0x207   :  { %v668_v3 = vpop.f32.mrf.mxu2 }
 0x208   :  { %1319 = vst [vmem:[%s1753_s4 + $0x8] sm:$0xff] %v1247_v2   ;;  %v669_v11 = vadd.f32 %v668_v3, %v579_v31  ;;  %v725_v31 = vpop.f32.mrf.mxu3 }
 0x209   :  { %v726_v32 = vadd.f32 %v725_v31, %v1610_v23 }
 0x20a   :  { %v845_v19 = vadd.f32 %v1631_v36, %v669_v11 }
 0x20b   :  { %v868_v35 = vadd.f32 %v1631_v36, %v726_v32 }
 0x20c   :  { %v877_v25 = vmax.f32 %v845_v19, 0.0 }
 0x20d   :  { %v900_v40 = vmax.f32 %v868_v35, 0.0 }
 0x20f   :  { %v670_v10 = vpop.f32.mrf.mxu2 }
 0x210   :  { %v671_v13 = vadd.f32 %v670_v10, %v581_v34  ;;  %v867_v34 = vadd.f32 %v1631_v36, %v724_v30  ;;  %v728_v46 = vpop.f32.mrf.mxu3 }
 0x211   :  { %v729_v51 = vadd.f32 %v728_v46, %v1618_v26 }
 0x212   :  { %v846_v22 = vadd.f32 %v1631_v36, %v671_v13  ;;  %v899_v38 = vmax.f32 %v867_v34, 0.0 }
 0x213   :  { %v869_v55 = vadd.f32 %v1631_v36, %v729_v51 }
 0x214   :  { %v878_v27 = vmax.f32 %v846_v22, 0.0  ;;  %712 = vmatmul.bf16.gmra.mxu2 %v1156_v20  ;;  %v1307_v42 = vpack.c.bf16 %v900_v40, %v899_v38 }
 0x216   :  { %v1252_v28 = vpack.c.bf16 %v878_v27, %v877_v25  ;;  %1331 = vst [vmem:[%s1753_s4 + $0x68] sm:$0xff] %v1307_v42  }
 0x217   :  { %v673_v29 = vpop.f32.mrf.mxu2 }
 0x218   :  { %1320 = vst [vmem:[%s1753_s4 + $0x10] sm:$0xff] %v1252_v28   ;;  %v674_v37 = vadd.f32 %v673_v29, %v584_v50  ;;  %v596_v50 = vpop.f32.mrf.mxu1  ;;  %v730_v52 = vpop.f32.mrf.mxu3 }
 0x219   :  { %v731_v54 = vadd.f32 %v730_v52, %v1626_v33 }
 0x21a   :  { %v847_v43 = vadd.f32 %v1631_v36, %v674_v37 }
 0x21b   :  { %v870_v56 = vadd.f32 %v1631_v36, %v731_v54 }
 0x21c   :  { %v879_v23 = vmax.f32 %v847_v43, 0.0 }
 0x21d   :  { %v902_v59 = vmax.f32 %v870_v56, 0.0 }
 0x21f   :  { %v675_v41 = vpop.f32.mrf.mxu2 }
 0x220   :  { %v676_v44 = vadd.f32 %v675_v41, %v586_v58  ;;  %v901_v58 = vmax.f32 %v869_v55, 0.0  ;;  %v733_v0 = vpop.f32.mrf.mxu3  ;;  %v599_v1 = vpop.f32.mrf.mxu1 }
 0x221   :  { %v734_v5 = vadd.f32 %v733_v0, %v1646_v45 }
 0x222   :  { %v848_v17 = vadd.f32 %v1631_v36, %v676_v44  ;;  %v1312_v61 = vpack.c.bf16 %v902_v59, %v901_v58 }
 0x223   :  { %v871_v8 = vadd.f32 %v1631_v36, %v734_v5 }
 0x224   :  { %v880_v47 = vmax.f32 %v848_v17, 0.0  ;;  %1332 = vst [vmem:[%s1753_s4 + $0x70] sm:$0xff] %v1312_v61  }
 0x225   :  { %v903_v14 = vmax.f32 %v871_v8, 0.0 }
 0x226   :  { %v1257_v48 = vpack.c.bf16 %v880_v47, %v879_v23 }
 0x227   :  { %v678_v49 = vpop.f32.mrf.mxu2 }
 0x228   :  { %1321 = vst [vmem:[%s1753_s4 + $0x18] sm:$0xff] %v1257_v48   ;;  %v679_v57 = vadd.f32 %v678_v49, %v589_v6  ;;  %v735_v6 = vpop.f32.mrf.mxu3  ;;  %v601_v9 = vpop.f32.mrf.mxu1 }
 0x229   :  { %v736_v7 = vadd.f32 %v735_v6, %v1652_v53 }
 0x22a   :  { %v849_v62 = vadd.f32 %v1631_v36, %v679_v57 }
 0x22b   :  { %v872_v11 = vadd.f32 %v1631_v36, %v736_v7 }
 0x22c   :  { %v881_v33 = vmax.f32 %v849_v62, 0.0 }
 0x22d   :  { %v904_v15 = vmax.f32 %v872_v11, 0.0 }
 0x22f   :  { %v680_v60 = vpop.f32.mrf.mxu2  ;;  %v1317_v10 = vpack.c.bf16 %v904_v15, %v903_v14 }
 0x230   :  { %v681_v63 = vadd.f32 %v680_v60, %v591_v24  ;;  %v604_v20 = vpop.f32.mrf.mxu1 }
 0x231   :  { %1333 = vst [vmem:[%s1753_s4 + $0x78] sm:$0xff] %v1317_v10  }
 0x232   :  { %v850_v26 = vadd.f32 %v1631_v36, %v681_v63 }
 0x234   :  { %v882_v2 = vmax.f32 %v850_v26, 0.0 }
 0x236   :  { %v1262_v3 = vpack.c.bf16 %v882_v2, %v881_v33 }
 0x237   :  { %v683_v4 = vpop.f32.mrf.mxu2 }
 0x238   :  { %1322 = vst [vmem:[%s1753_s4 + $0x20] sm:$0xff] %v1262_v3   ;;  %v684_v12 = vadd.f32 %v683_v4, %v594_v39  ;;  %v606_v27 = vpop.f32.mrf.mxu1 }
 0x23a   :  { %v851_v18 = vadd.f32 %v1631_v36, %v684_v12 }
 0x23c   :  { %v883_v53 = vmax.f32 %v851_v18, 0.0 }
 0x23f   :  { %v685_v16 = vpop.f32.mrf.mxu2 }
 0x240   :  { %v686_v19 = vadd.f32 %v685_v16, %v596_v50  ;;  %v609_v37 = vpop.f32.mrf.mxu1 }
 0x242   :  { %v852_v45 = vadd.f32 %v1631_v36, %v686_v19 }
 0x244   :  { %v884_v13 = vmax.f32 %v852_v45, 0.0 }
 0x246   :  { %v1267_v21 = vpack.c.bf16 %v884_v13, %v883_v53 }
 0x247   :  { %v688_v22 = vpop.f32.mrf.mxu2 }
 0x248   :  { %1323 = vst [vmem:[%s1753_s4 + $0x28] sm:$0xff] %v1267_v21   ;;  %v689_v24 = vadd.f32 %v688_v22, %v599_v1  ;;  %v611_v43 = vpop.f32.mrf.mxu1 }
 0x24a   :  { %v853_v28 = vadd.f32 %v1631_v36, %v689_v24 }
 0x24c   :  { %v885_v31 = vmax.f32 %v853_v28, 0.0 }
 0x24f   :  { %v690_v25 = vpop.f32.mrf.mxu2 }
 0x250   :  { %v691_v29 = vadd.f32 %v690_v25, %v601_v9  ;;  %v614_v48 = vpop.f32.mrf.mxu1 }
 0x252   :  { %v854_v30 = vadd.f32 %v1631_v36, %v691_v29 }
 0x254   :  { %v886_v32 = vmax.f32 %v854_v30, 0.0 }
 0x256   :  { %v1272_v34 = vpack.c.bf16 %v886_v32, %v885_v31 }
 0x257   :  { %v693_v35 = vpop.f32.mrf.mxu2 }
 0x258   :  { %1324 = vst [vmem:[%s1753_s4 + $0x30] sm:$0xff] %v1272_v34   ;;  %v694_v38 = vadd.f32 %v693_v35, %v604_v20  ;;  %v616_v57 = vpop.f32.mrf.mxu1 }
 0x25a   :  { %v855_v40 = vadd.f32 %v1631_v36, %v694_v38 }
 0x25c   :  { %v887_v44 = vmax.f32 %v855_v40, 0.0 }
 0x25f   :  { %v695_v39 = vpop.f32.mrf.mxu2 }
 0x260   :  { %v696_v41 = vadd.f32 %v695_v39, %v606_v27  ;;  %v619_v63 = vpop.f32.mrf.mxu1 }
 0x262   :  { %v856_v42 = vadd.f32 %v1631_v36, %v696_v41 }
 0x264   :  { %v888_v46 = vmax.f32 %v856_v42, 0.0 }
 0x266   :  { %v1277_v17 = vpack.c.bf16 %v888_v46, %v887_v44 }
 0x267   :  { %v698_v23 = vpop.f32.mrf.mxu2 }
 0x268   :  { %1325 = vst [vmem:[%s1753_s4 + $0x38] sm:$0xff] %v1277_v17   ;;  %v699_v47 = vadd.f32 %v698_v23, %v609_v37  ;;  %v621_v3 = vpop.f32.mrf.mxu1 }
 0x26a   :  { %v857_v50 = vadd.f32 %v1631_v36, %v699_v47 }
 0x26c   :  { %v889_v54 = vmax.f32 %v857_v50, 0.0 }
 0x26f   :  { %v700_v49 = vpop.f32.mrf.mxu2 }
 0x270   :  { %v701_v51 = vadd.f32 %v700_v49, %v611_v43  ;;  %v624_v12 = vpop.f32.mrf.mxu1 }
 0x272   :  { %v858_v52 = vadd.f32 %v1631_v36, %v701_v51 }
 0x274   :  { %v890_v55 = vmax.f32 %v858_v52, 0.0 }
 0x276   :  { %v1282_v56 = vpack.c.bf16 %v890_v55, %v889_v54 }
 0x277   :  { %v703_v58 = vpop.f32.mrf.mxu2 }
 0x278   :  { %1326 = vst [vmem:[%s1753_s4 + $0x40] sm:$0xff] %v1282_v56   ;;  %v704_v59 = vadd.f32 %v703_v58, %v614_v48  ;;  %v626_v10 = vpop.f32.mrf.mxu1 }
 0x27a   :  { %v859_v61 = vadd.f32 %v1631_v36, %v704_v59 }
 0x27c   :  { %v891_v1 = vmax.f32 %v859_v61, 0.0 }
 0x27f   :  { %v705_v60 = vpop.f32.mrf.mxu2 }
 0x280   :  { %v706_v62 = vadd.f32 %v705_v60, %v616_v57 }
 0x282   :  { %v860_v0 = vadd.f32 %v1631_v36, %v706_v62 }
 0x284   :  { %v892_v26 = vmax.f32 %v860_v0, 0.0 }
 0x286   :  { %v1287_v33 = vpack.c.bf16 %v892_v26, %v891_v1 }
 0x287   :  { %v708_v2 = vpop.f32.mrf.mxu2 }
 0x288   :  { %1327 = vst [vmem:[%s1753_s4 + $0x48] sm:$0xff] %v1287_v33   ;;  %v709_v4 = vadd.f32 %v708_v2, %v619_v63 }
 0x28a   :  { %v861_v6 = vadd.f32 %v1631_v36, %v709_v4 }
 0x28c   :  { %v893_v9 = vmax.f32 %v861_v6, 0.0 }
 0x28f   :  { %v710_v5 = vpop.f32.mrf.mxu2 }
 0x290   :  { %v711_v7 = vadd.f32 %v710_v5, %v621_v3 }
 0x292   :  { %v862_v8 = vadd.f32 %v1631_v36, %v711_v7 }
 0x294   :  { %v894_v11 = vmax.f32 %v862_v8, 0.0 }
 0x296   :  { %v1292_v14 = vpack.c.bf16 %v894_v11, %v893_v9 }
 0x297   :  { %v713_v15 = vpop.f32.mrf.mxu2 }
 0x298   :  { %1328 = vst [vmem:[%s1753_s4 + $0x50] sm:$0xff] %v1292_v14   ;;  %v714_v16 = vadd.f32 %v713_v15, %v624_v12 }
 0x29a   :  { %v863_v19 = vadd.f32 %v1631_v36, %v714_v16 }
 0x29c   :  { %v895_v13 = vmax.f32 %v863_v19, 0.0 }
 0x29f   :  { %v715_v18 = vpop.f32.mrf.mxu2 }
 0x2a0   :  { %v716_v45 = vadd.f32 %v715_v18, %v626_v10 }
 0x2a2   :  { %v864_v53 = vadd.f32 %v1631_v36, %v716_v45 }
 0x2a4   :  { %v896_v20 = vmax.f32 %v864_v53, 0.0 }
 0x2a6   :  { %v1297_v21 = vpack.c.bf16 %v896_v20, %v895_v13 }
 0x2a8   :  { %1329 = vst [vmem:[%s1753_s4 + $0x58] sm:$0xff] %v1297_v21  }

// kernel: gcn_forward.3
= control target key start
LH: loop header
LB: loop body
LE: loop exit
PB: predicated region body
PF: predicated region fallthrough
CT: control target
= control target key end

     0   :  { %s2208_s1 = inlined_call_operand.vmem [shape: bf16[256,128], index: 1, kind: input, shape index: {}]   ;;  %s2209_s0 = inlined_call_operand.vmem [shape: bf16[256,256], index: 0, kind: input, shape index: {}]   ;;  %s2210_s2 = inlined_call_operand.vmem [shape: f32[1,128], index: 2, kind: input, shape index: {}]   ;;  %s2211_s3 = inlined_call_operand.vmem [shape: f32[256,128], index: 3, kind: output, shape index: {}]  }
   0x1   :  { %v1337_v0 = vld [vmem:[%s2208_s1 + $0x38] sm:$0xff]  ;;  %v1336_v2 = vld [vmem:[%s2208_s1 + $0x30] sm:$0xff]  ;;  %v1335_v4 = vld [vmem:[%s2208_s1 + $0x28] sm:$0xff] }
   0x2   :  { %v1345_v1 = vld [vmem:[%s2208_s1 + $0x78] sm:$0xff]  ;;  %402 = vmatpush.bf16.msra.mxu0 %v1337_v0  ;;  %1346 = vmatpush.bf16.msra.mxu2 %v1337_v0  ;;  %v1344_v3 = vld [vmem:[%s2208_s1 + $0x70] sm:$0xff]  ;;  %v1343_v5 = vld [vmem:[%s2208_s1 + $0x68] sm:$0xff] }
   0x3   :  { %491 = vmatpush.bf16.msra.mxu1 %v1345_v1  ;;  %1354 = vmatpush.bf16.msra.mxu3 %v1345_v1  ;;  %v1334_v6 = vld [vmem:[%s2208_s1 + $0x20] sm:$0xff]  ;;  %v1333_v8 = vld [vmem:[%s2208_s1 + $0x18] sm:$0xff]  ;;  %v1332_v10 = vld [vmem:[%s2208_s1 + $0x10] sm:$0xff] }
   0x4   :  { %v1342_v7 = vld [vmem:[%s2208_s1 + $0x60] sm:$0xff]  ;;  %v1341_v9 = vld [vmem:[%s2208_s1 + $0x58] sm:$0xff]  ;;  %v1340_v11 = vld [vmem:[%s2208_s1 + $0x50] sm:$0xff] }
   0x5   :  { %v1331_v12 = vld [vmem:[%s2208_s1 + $0x8] sm:$0xff]  ;;  %v1330_v14 = vld [vmem:[%s2208_s1] sm:$0xff]  ;;  %v1116_v28 = vld [vmem:[%s2209_s0 + $0x10] sm:$0xf] }
   0x6   :  { %403 = vmatpush.bf16.msra.mxu0 %v1336_v2  ;;  %1347 = vmatpush.bf16.msra.mxu2 %v1336_v2  ;;  %v1339_v13 = vld [vmem:[%s2208_s1 + $0x48] sm:$0xff]  ;;  %v1338_v15 = vld [vmem:[%s2208_s1 + $0x40] sm:$0xff]  ;;  %v1301_v29 = vld [vmem:[%s2209_s0 + $0x14] sm:$0xf0] }
   0x7   :  { %492 = vmatpush.bf16.msra.mxu1 %v1344_v3  ;;  %1355 = vmatpush.bf16.msra.mxu3 %v1344_v3  ;;  %v1108_v16 = vld [vmem:[%s2209_s0] sm:$0xf]  ;;  %v1299_v17 = vld [vmem:[%s2209_s0 + $0x4] sm:$0xf0]  ;;  %v1298_v20 = vld [vmem:[%s2209_s0 + $0x4] sm:$0xf]  ;;  %v1117_v36 = vor.u32 %v1301_v29, %v1116_v28 }
   0x8   :  { %v1172_v18 = vld [vmem:[%s2209_s0 + $0x80] sm:$0xf]  ;;  %v1315_v19 = vld [vmem:[%s2209_s0 + $0x84] sm:$0xf0]  ;;  %v1110_v21 = vld [vmem:[%s2209_s0 + $0x8] sm:$0xf0]  ;;  %v1109_v24 = vor.u32 %v1299_v17, %v1108_v16 }
   0x9   :  { %v1314_v22 = vld [vmem:[%s2209_s0 + $0x84] sm:$0xf]  ;;  %v1174_v23 = vld [vmem:[%s2209_s0 + $0x88] sm:$0xf0]  ;;  %v1173_v25 = vor.u32 %v1315_v19, %v1172_v18  ;;  %v1113_v26 = vor.u32 %v1298_v20, %v1110_v21  ;;  %v1180_v30 = vld [vmem:[%s2209_s0 + $0x90] sm:$0xf] }
   0xa   :  { %404 = vmatpush.bf16.msra.mxu0 %v1335_v4  ;;  %1348 = vmatpush.bf16.msra.mxu2 %v1335_v4  ;;  %v1177_v27 = vor.u32 %v1314_v22, %v1174_v23  ;;  %v1317_v31 = vld [vmem:[%s2209_s0 + $0x94] sm:$0xf0]  ;;  %v1300_v32 = vld [vmem:[%s2209_s0 + $0x14] sm:$0xf]  ;;  %v1118_v33 = vld [vmem:[%s2209_s0 + $0x18] sm:$0xf0] }
   0xb   :  { %493 = vmatpush.bf16.msra.mxu1 %v1343_v5  ;;  %1356 = vmatpush.bf16.msra.mxu3 %v1343_v5  ;;  %v1316_v34 = vld [vmem:[%s2209_s0 + $0x94] sm:$0xf]  ;;  %v1182_v35 = vld [vmem:[%s2209_s0 + $0x98] sm:$0xf0]  ;;  %v1181_v37 = vor.u32 %v1317_v31, %v1180_v30  ;;  %v1121_v38 = vor.u32 %v1300_v32, %v1118_v33  ;;  %v1124_v40 = vld [vmem:[%s2209_s0 + $0x20] sm:$0xf] }
   0xc   :  { %v1185_v39 = vor.u32 %v1316_v34, %v1182_v35  ;;  %v1303_v41 = vld [vmem:[%s2209_s0 + $0x24] sm:$0xf0]  ;;  %v1188_v42 = vld [vmem:[%s2209_s0 + $0xa0] sm:$0xf]  ;;  %v1302_v44 = vld [vmem:[%s2209_s0 + $0x24] sm:$0xf] }
   0xd   :  { %v1319_v43 = vld [vmem:[%s2209_s0 + $0xa4] sm:$0xf0]  ;;  %v1126_v45 = vld [vmem:[%s2209_s0 + $0x28] sm:$0xf0]  ;;  %v1318_v46 = vld [vmem:[%s2209_s0 + $0xa4] sm:$0xf]  ;;  %v1125_v48 = vor.u32 %v1303_v41, %v1124_v40 }
   0xe   :  { %405 = vmatpush.bf16.msra.mxu0 %v1334_v6  ;;  %1349 = vmatpush.bf16.msra.mxu2 %v1334_v6  ;;  %v1190_v47 = vld [vmem:[%s2209_s0 + $0xa8] sm:$0xf0]  ;;  %v1189_v49 = vor.u32 %v1319_v43, %v1188_v42  ;;  %v1129_v50 = vor.u32 %v1302_v44, %v1126_v45  ;;  %v1132_v52 = vld [vmem:[%s2209_s0 + $0x30] sm:$0xf]  ;;  %v1305_v53 = vld [vmem:[%s2209_s0 + $0x34] sm:$0xf0] }
   0xf   :  { %494 = vmatpush.bf16.msra.mxu1 %v1342_v7  ;;  %1357 = vmatpush.bf16.msra.mxu3 %v1342_v7  ;;  %v1193_v51 = vor.u32 %v1318_v46, %v1190_v47  ;;  %v1196_v54 = vld [vmem:[%s2209_s0 + $0xb0] sm:$0xf]  ;;  %v1321_v55 = vld [vmem:[%s2209_s0 + $0xb4] sm:$0xf0]  ;;  %v1304_v56 = vld [vmem:[%s2209_s0 + $0x34] sm:$0xf]  ;;  %v1133_v60 = vor.u32 %v1305_v53, %v1132_v52 }
  0x10   :  { %v1134_v57 = vld [vmem:[%s2209_s0 + $0x38] sm:$0xf0]  ;;  %v1320_v58 = vld [vmem:[%s2209_s0 + $0xb4] sm:$0xf]  ;;  %v1197_v61 = vor.u32 %v1321_v55, %v1196_v54  ;;  %v1140_v0 = vld [vmem:[%s2209_s0 + $0x40] sm:$0xf] }
  0x11   :  { %v1198_v59 = vld [vmem:[%s2209_s0 + $0xb8] sm:$0xf0]  ;;  %v1137_v62 = vor.u32 %v1304_v56, %v1134_v57  ;;  %v1307_v1 = vld [vmem:[%s2209_s0 + $0x44] sm:$0xf0]  ;;  %v1204_v2 = vld [vmem:[%s2209_s0 + $0xc0] sm:$0xf] }
  0x12   :  { %406 = vmatpush.bf16.msra.mxu0 %v1333_v8  ;;  %1350 = vmatpush.bf16.msra.mxu2 %v1333_v8  ;;  %v1201_v63 = vor.u32 %v1320_v58, %v1198_v59  ;;  %v1323_v3 = vld [vmem:[%s2209_s0 + $0xc4] sm:$0xf0]  ;;  %v1306_v4 = vld [vmem:[%s2209_s0 + $0x44] sm:$0xf]  ;;  %v1142_v5 = vld [vmem:[%s2209_s0 + $0x48] sm:$0xf0]  ;;  %v1141_v8 = vor.u32 %v1307_v1, %v1140_v0 }
  0x13   :  { %495 = vmatpush.bf16.msra.mxu1 %v1341_v9  ;;  %1358 = vmatpush.bf16.msra.mxu3 %v1341_v9  ;;  %v1322_v6 = vld [vmem:[%s2209_s0 + $0xc4] sm:$0xf]  ;;  %v1206_v7 = vld [vmem:[%s2209_s0 + $0xc8] sm:$0xf0]  ;;  %v1205_v9 = vor.u32 %v1323_v3, %v1204_v2  ;;  %v1308_v16 = vld [vmem:[%s2209_s0 + $0x54] sm:$0xf] }
  0x14   :  { %v1150_v17 = vld [vmem:[%s2209_s0 + $0x58] sm:$0xf0]  ;;  %v1324_v18 = vld [vmem:[%s2209_s0 + $0xd4] sm:$0xf]  ;;  %v1310_v28 = vld [vmem:[%s2209_s0 + $0x64] sm:$0xf] }
  0x15   :  { %v1214_v19 = vld [vmem:[%s2209_s0 + $0xd8] sm:$0xf0]  ;;  %v1153_v22 = vor.u32 %v1308_v16, %v1150_v17  ;;  %v1158_v29 = vld [vmem:[%s2209_s0 + $0x68] sm:$0xf0]  ;;  %v1326_v30 = vld [vmem:[%s2209_s0 + $0xe4] sm:$0xf] }
  0x16   :  { %407 = vmatpush.bf16.msra.mxu0 %v1332_v10  ;;  %1351 = vmatpush.bf16.msra.mxu2 %v1332_v10  ;;  %v1145_v10 = vor.u32 %v1306_v4, %v1142_v5  ;;  %v1217_v23 = vor.u32 %v1324_v18, %v1214_v19  ;;  %v1222_v31 = vld [vmem:[%s2209_s0 + $0xe8] sm:$0xf0]  ;;  %v1161_v34 = vor.u32 %v1310_v28, %v1158_v29  ;;  %v1312_v40 = vld [vmem:[%s2209_s0 + $0x74] sm:$0xf]  ;;  %v1166_v41 = vld [vmem:[%s2209_s0 + $0x78] sm:$0xf0] }
  0x17   :  { %496 = vmatpush.bf16.msra.mxu1 %v1340_v11  ;;  %1359 = vmatpush.bf16.msra.mxu3 %v1340_v11  ;;  %v1209_v11 = vor.u32 %v1322_v6, %v1206_v7  ;;  %v1225_v35 = vor.u32 %v1326_v30, %v1222_v31  ;;  %v1328_v42 = vld [vmem:[%s2209_s0 + $0xf4] sm:$0xf]  ;;  %v1230_v43 = vld [vmem:[%s2209_s0 + $0xf8] sm:$0xf0]  ;;  %v1169_v46 = vor.u32 %v1312_v40, %v1166_v41  ;;  %v1757_v53 = vld [vmem:[%s2210_s2] ss:$0 sm:$0xff] }
  0x18   :  { %v1233_v47 = vor.u32 %v1328_v42, %v1230_v43 }
  0x1a   :  { %408 = vmatpush.bf16.msra.mxu0 %v1331_v12  ;;  %1352 = vmatpush.bf16.msra.mxu2 %v1331_v12  ;;  %v1148_v12 = vld [vmem:[%s2209_s0 + $0x50] sm:$0xf] }
  0x1b   :  { %497 = vmatpush.bf16.msra.mxu1 %v1339_v13  ;;  %1360 = vmatpush.bf16.msra.mxu3 %v1339_v13  ;;  %v1309_v13 = vld [vmem:[%s2209_s0 + $0x54] sm:$0xf0] }
  0x1c   :  { %v1149_v20 = vor.u32 %v1309_v13, %v1148_v12 }
  0x1e   :  { %409 = vmatpush.bf16.msra.mxu0 %v1330_v14  ;;  %1353 = vmatpush.bf16.msra.mxu2 %v1330_v14  ;;  %v1212_v14 = vld [vmem:[%s2209_s0 + $0xd0] sm:$0xf] }
  0x1f   :  { %498 = vmatpush.bf16.msra.mxu1 %v1338_v15  ;;  %1361 = vmatpush.bf16.msra.mxu3 %v1338_v15  ;;  %v1325_v15 = vld [vmem:[%s2209_s0 + $0xd4] sm:$0xf0] }
  0x20   :  { %v1213_v21 = vor.u32 %v1325_v15, %v1212_v14 }
  0x21   :  { %410 = vmatmul.bf16.vlgmr.msra.gmra.mxu0 %v1109_v24  ;;  %450 = vmatmul.bf16.vlgmr.msra.gmra.mxu2 %v1173_v25  ;;  %v1156_v24 = vld [vmem:[%s2209_s0 + $0x60] sm:$0xf]  ;;  %v1311_v25 = vld [vmem:[%s2209_s0 + $0x64] sm:$0xf0] }
  0x22   :  { %499 = vmatmul.bf16.vlgmr.msra.gmra.mxu1 %v1113_v26  ;;  %539 = vmatmul.bf16.vlgmr.msra.gmra.mxu3 %v1177_v27  ;;  %v1220_v26 = vld [vmem:[%s2209_s0 + $0xe0] sm:$0xf]  ;;  %v1327_v27 = vld [vmem:[%s2209_s0 + $0xe4] sm:$0xf0]  ;;  %v1157_v32 = vor.u32 %v1311_v25, %v1156_v24 }
  0x23   :  { %v1221_v33 = vor.u32 %v1327_v27, %v1220_v26 }
  0x31   :  { %415 = vmatmul.bf16.gmra.mxu0 %v1117_v36  ;;  %455 = vmatmul.bf16.gmra.mxu2 %v1181_v37  ;;  %v1164_v36 = vld [vmem:[%s2209_s0 + $0x70] sm:$0xf]  ;;  %v1313_v37 = vld [vmem:[%s2209_s0 + $0x74] sm:$0xf0] }
  0x32   :  { %504 = vmatmul.bf16.gmra.mxu1 %v1121_v38  ;;  %544 = vmatmul.bf16.gmra.mxu3 %v1185_v39  ;;  %v1228_v38 = vld [vmem:[%s2209_s0 + $0xf0] sm:$0xf]  ;;  %v1329_v39 = vld [vmem:[%s2209_s0 + $0xf4] sm:$0xf0]  ;;  %v1165_v44 = vor.u32 %v1313_v37, %v1164_v36 }
  0x33   :  { %v1229_v45 = vor.u32 %v1329_v39, %v1228_v38 }
  0x41   :  { %420 = vmatmul.bf16.gmra.mxu0 %v1125_v48  ;;  %460 = vmatmul.bf16.gmra.mxu2 %v1189_v49  ;;  %v715_v48 = vlaneseq }
  0x42   :  { %509 = vmatmul.bf16.gmra.mxu1 %v1129_v50  ;;  %549 = vmatmul.bf16.gmra.mxu3 %v1193_v51 }
  0x43   :  { %v1752_v51 = vand.u32 127, %v715_v48 }
  0x45   :  { %vm717_vm0 = vcmp.lt.s32.totalorder %v1752_v51, 8 }
  0x51   :  { %425 = vmatmul.bf16.gmra.mxu0 %v1133_v60  ;;  %465 = vmatmul.bf16.gmra.mxu2 %v1197_v61 }
  0x52   :  { %514 = vmatmul.bf16.gmra.mxu1 %v1137_v62  ;;  %554 = vmatmul.bf16.gmra.mxu3 %v1201_v63 }
  0x61   :  { %430 = vmatmul.bf16.gmra.mxu0 %v1141_v8  ;;  %470 = vmatmul.bf16.gmra.mxu2 %v1205_v9 }
  0x62   :  { %519 = vmatmul.bf16.gmra.mxu1 %v1145_v10  ;;  %559 = vmatmul.bf16.gmra.mxu3 %v1209_v11 }
  0x71   :  { %435 = vmatmul.bf16.gmra.mxu0 %v1149_v20  ;;  %475 = vmatmul.bf16.gmra.mxu2 %v1213_v21 }
  0x72   :  { %524 = vmatmul.bf16.gmra.mxu1 %v1153_v22  ;;  %564 = vmatmul.bf16.gmra.mxu3 %v1217_v23 }
  0x81   :  { %440 = vmatmul.bf16.gmra.mxu0 %v1157_v32  ;;  %480 = vmatmul.bf16.gmra.mxu2 %v1221_v33 }
  0x82   :  { %529 = vmatmul.bf16.gmra.mxu1 %v1161_v34  ;;  %569 = vmatmul.bf16.gmra.mxu3 %v1225_v35 }
  0x91   :  { %445 = vmatmul.bf16.gmra.mxu0 %v1165_v44  ;;  %485 = vmatmul.bf16.gmra.mxu2 %v1229_v45 }
  0x92   :  { %534 = vmatmul.bf16.gmra.mxu1 %v1169_v46  ;;  %574 = vmatmul.bf16.gmra.mxu3 %v1233_v47 }
  0x9e   :  { %v411_v49 = vpop.f32.mrf.mxu0 }
  0x9f   :  { %v500_v50 = vpop.f32.mrf.mxu1 }
  0xa0   :  { %v501_v52 = vadd.f32 %v500_v50, %v411_v49 }
  0xa2   :  { %v683_v55 = vadd.f32 %v1757_v53, %v501_v52 }
  0xa4   :  { %v451_v54 = vpop.f32.mrf.mxu2  ;;  %v1763_v59 = vsel %vm717_vm0, %v683_v55, -1e+30 }
  0xa5   :  { %v540_v56 = vpop.f32.mrf.mxu3  ;;  %750 = vmax.xlane.f32.xlu0 %v1763_v59 }
  0xa6   :  { %v541_v57 = vadd.f32 %v540_v56, %v451_v54  ;;  %v413_v58 = vpop.f32.mrf.mxu0 }
  0xa7   :  { %v502_v60 = vpop.f32.mrf.mxu1 }
  0xa8   :  { %v503_v61 = vadd.f32 %v502_v60, %v413_v58  ;;  %v699_v62 = vadd.f32 %v1757_v53, %v541_v57 }
  0xaa   :  { %v1769_v0 = vsel %vm717_vm0, %v699_v62, -1e+30  ;;  %v684_v1 = vadd.f32 %v1757_v53, %v503_v61 }
  0xab   :  { %782 = vmax.xlane.f32.xlu1 %v1769_v0 }
  0xac   :  { %v453_v63 = vpop.f32.mrf.mxu2  ;;  %v1775_v5 = vsel %vm717_vm0, %v684_v1, -1e+30 }
  0xad   :  { %v542_v2 = vpop.f32.mrf.mxu3  ;;  %752 = vmax.xlane.f32.xlu0 %v1775_v5 }
  0xae   :  { %v543_v3 = vadd.f32 %v542_v2, %v453_v63  ;;  %v416_v4 = vpop.f32.mrf.mxu0 }
  0xaf   :  { %v505_v6 = vpop.f32.mrf.mxu1 }
  0xb0   :  { %v506_v7 = vadd.f32 %v505_v6, %v416_v4  ;;  %v700_v8 = vadd.f32 %v1757_v53, %v543_v3 }
  0xb2   :  { %v1781_v10 = vsel %vm717_vm0, %v700_v8, -1e+30  ;;  %v685_v11 = vadd.f32 %v1757_v53, %v506_v7 }
  0xb3   :  { %784 = vmax.xlane.f32.xlu2 %v1781_v10 }
  0xb4   :  { %v456_v9 = vpop.f32.mrf.mxu2  ;;  %v1787_v15 = vsel %vm717_vm0, %v685_v11, -1e+30 }
  0xb5   :  { %v545_v12 = vpop.f32.mrf.mxu3  ;;  %754 = vmax.xlane.f32.xlu1 %v1787_v15 }
  0xb6   :  { %v546_v13 = vadd.f32 %v545_v12, %v456_v9  ;;  %v418_v14 = vpop.f32.mrf.mxu0 }
  0xb7   :  { %v507_v16 = vpop.f32.mrf.mxu1 }
  0xb8   :  { %v508_v17 = vadd.f32 %v507_v16, %v418_v14  ;;  %v701_v18 = vadd.f32 %v1757_v53, %v546_v13 }
  0xba   :  { %v1793_v20 = vsel %vm717_vm0, %v701_v18, -1e+30  ;;  %v686_v21 = vadd.f32 %v1757_v53, %v508_v17 }
  0xbb   :  { %786 = vmax.xlane.f32.xlu0 %v1793_v20 }
  0xbc   :  { %v458_v19 = vpop.f32.mrf.mxu2  ;;  %v1799_v25 = vsel %vm717_vm0, %v686_v21, -1e+30 }
  0xbd   :  { %v547_v22 = vpop.f32.mrf.mxu3  ;;  %756 = vmax.xlane.f32.xlu1 %v1799_v25 }
  0xbe   :  { %v548_v23 = vadd.f32 %v547_v22, %v458_v19  ;;  %v421_v24 = vpop.f32.mrf.mxu0 }
  0xbf   :  { %v510_v26 = vpop.f32.mrf.mxu1 }
  0xc0   :  { %v511_v27 = vadd.f32 %v510_v26, %v421_v24  ;;  %v702_v28 = vadd.f32 %v1757_v53, %v548_v23 }
  0xc2   :  { %v687_v30 = vadd.f32 %v1757_v53, %v511_v27  ;;  %v1810_v35 = vsel %vm717_vm0, %v702_v28, -1e+30 }
  0xc4   :  { %v461_v29 = vpop.f32.mrf.mxu2  ;;  %v1806_v34 = vsel %vm717_vm0, %v687_v30, -1e+30 }
  0xc5   :  { %v550_v31 = vpop.f32.mrf.mxu3  ;;  %758 = vmax.xlane.f32.xlu2 %v1806_v34  ;;  %788 = vmax.xlane.f32.xlu1 %v1810_v35 }
  0xc6   :  { %v551_v32 = vadd.f32 %v550_v31, %v461_v29  ;;  %v423_v33 = vpop.f32.mrf.mxu0 }
  0xc7   :  { %v512_v36 = vpop.f32.mrf.mxu1 }
  0xc8   :  { %v513_v37 = vadd.f32 %v512_v36, %v423_v33  ;;  %v703_v38 = vadd.f32 %v1757_v53, %v551_v32 }
  0xca   :  { %v1817_v43 = vsel %vm717_vm0, %v703_v38, -1e+30  ;;  %v688_v47 = vadd.f32 %v1757_v53, %v513_v37 }
  0xcc   :  { %v463_v39 = vpop.f32.mrf.mxu2  ;;  %v1829_v55 = vsel %vm717_vm0, %v688_v47, -1e+30 }
  0xcd   :  { %v552_v40 = vpop.f32.mrf.mxu3  ;;  %790 = vmax.xlane.f32.xlu2 %v1817_v43 }
  0xce   :  { %v553_v41 = vadd.f32 %v552_v40, %v463_v39  ;;  %v426_v42 = vpop.f32.mrf.mxu0 }
  0xcf   :  { %v515_v44 = vpop.f32.mrf.mxu1 }
  0xd0   :  { %v516_v45 = vadd.f32 %v515_v44, %v426_v42  ;;  %v704_v46 = vadd.f32 %v1757_v53, %v553_v41 }
  0xd2   :  { %v1824_v49 = vsel %vm717_vm0, %v704_v46, -1e+30  ;;  %v689_v56 = vadd.f32 %v1757_v53, %v516_v45 }
  0xd3   :  { %792 = vmax.xlane.f32.xlu0 %v1824_v49 }
  0xd4   :  { %v466_v48 = vpop.f32.mrf.mxu2  ;;  %v1836_v61 = vsel %vm717_vm0, %v689_v56, -1e+30 }
  0xd5   :  { %v555_v50 = vpop.f32.mrf.mxu3  ;;  %760 = vmax.xlane.f32.xlu2 %v1829_v55 }
  0xd6   :  { %v556_v52 = vadd.f32 %v555_v50, %v466_v48  ;;  %v428_v54 = vpop.f32.mrf.mxu0 }
  0xd7   :  { %v517_v57 = vpop.f32.mrf.mxu1 }
  0xd8   :  { %v518_v58 = vadd.f32 %v517_v57, %v428_v54  ;;  %v705_v60 = vadd.f32 %v1757_v53, %v556_v52 }
  0xda   :  { %v1840_v63 = vsel %vm717_vm0, %v705_v60, -1e+30  ;;  %v690_v7 = vadd.f32 %v1757_v53, %v518_v58 }
  0xdb   :  { %794 = vmax.xlane.f32.xlu1 %v1840_v63  ;;  %762 = vmax.xlane.f32.xlu0 %v1836_v61 }
  0xdc   :  { %v468_v62 = vpop.f32.mrf.mxu2  ;;  %v1852_v12 = vsel %vm717_vm0, %v690_v7, -1e+30 }
  0xdd   :  { %v557_v1 = vpop.f32.mrf.mxu3 }
  0xde   :  { %v558_v2 = vadd.f32 %v557_v1, %v468_v62  ;;  %v431_v3 = vpop.f32.mrf.mxu0 }
  0xdf   :  { %v520_v4 = vpop.f32.mrf.mxu1 }
  0xe0   :  { %v521_v6 = vadd.f32 %v520_v4, %v431_v3  ;;  %v706_v8 = vadd.f32 %v1757_v53, %v558_v2 }
  0xe2   :  { %v1848_v11 = vsel %vm717_vm0, %v706_v8, -1e+30  ;;  %v691_v17 = vadd.f32 %v1757_v53, %v521_v6 }
  0xe3   :  { %796 = vmax.xlane.f32.xlu2 %v1848_v11  ;;  %764 = vmax.xlane.f32.xlu1 %v1852_v12 }
  0xe4   :  { %v471_v9 = vpop.f32.mrf.mxu2  ;;  %v1859_v21 = vsel %vm717_vm0, %v691_v17, -1e+30 }
  0xe5   :  { %v560_v13 = vpop.f32.mrf.mxu3 }
  0xe6   :  { %v561_v14 = vadd.f32 %v560_v13, %v471_v9  ;;  %v433_v16 = vpop.f32.mrf.mxu0 }
  0xe7   :  { %v522_v18 = vpop.f32.mrf.mxu1 }
  0xe8   :  { %v523_v19 = vadd.f32 %v522_v18, %v433_v16  ;;  %v707_v22 = vadd.f32 %v1757_v53, %v561_v14 }
  0xea   :  { %v1864_v24 = vsel %vm717_vm0, %v707_v22, -1e+30  ;;  %v692_v31 = vadd.f32 %v1757_v53, %v523_v19 }
  0xeb   :  { %766 = vmax.xlane.f32.xlu2 %v1859_v21  ;;  %798 = vmax.xlane.f32.xlu0 %v1864_v24 }
  0xec   :  { %v473_v23 = vpop.f32.mrf.mxu2  ;;  %v1876_v37 = vsel %vm717_vm0, %v692_v31, -1e+30 }
  0xed   :  { %v562_v26 = vpop.f32.mrf.mxu3 }
  0xee   :  { %v563_v27 = vadd.f32 %v562_v26, %v473_v23  ;;  %v436_v28 = vpop.f32.mrf.mxu0 }
  0xef   :  { %v525_v29 = vpop.f32.mrf.mxu1 }
  0xf0   :  { %v526_v30 = vadd.f32 %v525_v29, %v436_v28  ;;  %v708_v32 = vadd.f32 %v1757_v53, %v563_v27 }
  0xf2   :  { %v1872_v36 = vsel %vm717_vm0, %v708_v32, -1e+30  ;;  %v693_v41 = vadd.f32 %v1757_v53, %v526_v30 }
  0xf3   :  { %800 = vmax.xlane.f32.xlu1 %v1872_v36  ;;  %768 = vmax.xlane.f32.xlu0 %v1876_v37 }
  0xf4   :  { %v476_v33 = vpop.f32.mrf.mxu2  ;;  %v1884_v46 = vsel %vm717_vm0, %v693_v41, -1e+30 }
  0xf5   :  { %v565_v38 = vpop.f32.mrf.mxu3 }
  0xf6   :  { %v566_v39 = vadd.f32 %v565_v38, %v476_v33  ;;  %v438_v40 = vpop.f32.mrf.mxu0 }
  0xf7   :  { %v527_v42 = vpop.f32.mrf.mxu1 }
  0xf8   :  { %v528_v44 = vadd.f32 %v527_v42, %v438_v40  ;;  %v709_v45 = vadd.f32 %v1757_v53, %v566_v39 }
  0xfa   :  { %v1888_v48 = vsel %vm717_vm0, %v709_v45, -1e+30  ;;  %v694_v58 = vadd.f32 %v1757_v53, %v528_v44 }
  0xfb   :  { %802 = vmax.xlane.f32.xlu2 %v1888_v48  ;;  %770 = vmax.xlane.f32.xlu1 %v1884_v46 }
  0xfc   :  { %v478_v47 = vpop.f32.mrf.mxu2  ;;  %v1896_v1 = vsel %vm717_vm0, %v694_v58, -1e+30 }
  0xfd   :  { %v567_v50 = vpop.f32.mrf.mxu3 }
  0xfe   :  { %v568_v52 = vadd.f32 %v567_v50, %v478_v47  ;;  %v441_v54 = vpop.f32.mrf.mxu0 }
  0xff   :  { %v530_v56 = vpop.f32.mrf.mxu1 }
 0x100   :  { %v531_v57 = vadd.f32 %v530_v56, %v441_v54  ;;  %v710_v60 = vadd.f32 %v1757_v53, %v568_v52 }
 0x102   :  { %v1900_v2 = vsel %vm717_vm0, %v710_v60, -1e+30  ;;  %v695_v7 = vadd.f32 %v1757_v53, %v531_v57 }
 0x103   :  { %772 = vmax.xlane.f32.xlu2 %v1896_v1  ;;  %804 = vmax.xlane.f32.xlu0 %v1900_v2 }
 0x104   :  { %v481_v62 = vpop.f32.mrf.mxu2  ;;  %v1908_v14 = vsel %vm717_vm0, %v695_v7, -1e+30 }
 0x105   :  { %v570_v3 = vpop.f32.mrf.mxu3 }
 0x106   :  { %v571_v4 = vadd.f32 %v570_v3, %v481_v62  ;;  %v443_v6 = vpop.f32.mrf.mxu0 }
 0x107   :  { %v532_v8 = vpop.f32.mrf.mxu1 }
 0x108   :  { %v533_v9 = vadd.f32 %v532_v8, %v443_v6  ;;  %v711_v13 = vadd.f32 %v1757_v53, %v571_v4 }
 0x10a   :  { %v1912_v17 = vsel %vm717_vm0, %v711_v13, -1e+30  ;;  %v696_v27 = vadd.f32 %v1757_v53, %v533_v9 }
 0x10b   :  { %806 = vmax.xlane.f32.xlu1 %v1912_v17  ;;  %774 = vmax.xlane.f32.xlu0 %v1908_v14 }
 0x10c   :  { %v483_v16 = vpop.f32.mrf.mxu2  ;;  %v1924_v31 = vsel %vm717_vm0, %v696_v27, -1e+30 }
 0x10d   :  { %v572_v18 = vpop.f32.mrf.mxu3 }
 0x10e   :  { %v573_v19 = vadd.f32 %v572_v18, %v483_v16  ;;  %v446_v22 = vpop.f32.mrf.mxu0 }
 0x10f   :  { %v535_v23 = vpop.f32.mrf.mxu1 }
 0x110   :  { %v536_v26 = vadd.f32 %v535_v23, %v446_v22  ;;  %v712_v28 = vadd.f32 %v1757_v53, %v573_v19 }
 0x112   :  { %v1920_v30 = vsel %vm717_vm0, %v712_v28, -1e+30  ;;  %v697_v39 = vadd.f32 %v1757_v53, %v536_v26 }
 0x113   :  { %808 = vmax.xlane.f32.xlu2 %v1920_v30  ;;  %776 = vmax.xlane.f32.xlu1 %v1924_v31 }
 0x114   :  { %v486_v29 = vpop.f32.mrf.mxu2  ;;  %v1931_v44 = vsel %vm717_vm0, %v697_v39, -1e+30 }
 0x115   :  { %v575_v32 = vpop.f32.mrf.mxu3 }
 0x116   :  { %v576_v33 = vadd.f32 %v575_v32, %v486_v29  ;;  %v448_v38 = vpop.f32.mrf.mxu0 }
 0x117   :  { %v537_v40 = vpop.f32.mrf.mxu1 }
 0x118   :  { %v538_v41 = vadd.f32 %v537_v40, %v448_v38  ;;  %v751_v42 = vpop.xlane.xlu0 %750  ;;  %v713_v45 = vadd.f32 %v1757_v53, %v576_v33 }
 0x119   :  { %v1935_v47 = vsub.f32 %v1763_v59, %v751_v42 }
 0x11a   :  { %v1939_v52 = vsel %vm717_vm0, %v713_v45, -1e+30  ;;  %v698_v60 = vadd.f32 %v1757_v53, %v538_v41 }
 0x11b   :  { %v846_v56 = vmul.f32 1.442695, %v1935_v47  ;;  %778 = vmax.xlane.f32.xlu2 %v1931_v44  ;;  %810 = vmax.xlane.f32.xlu0 %v1939_v52 }
 0x11c   :  { %v488_v50 = vpop.f32.mrf.mxu2  ;;  %v1956_v7 = vsel %vm717_vm0, %v698_v60, -1e+30 }
 0x11d   :  { %v577_v54 = vpop.f32.mrf.mxu3  ;;  %1364 = vpow2.f32 %v846_v56 }
 0x11e   :  { %v578_v57 = vadd.f32 %v577_v54, %v488_v50  ;;  %v783_v58 = vpop.xlane.xlu1 %782 }
 0x11f   :  { %v1946_v59 = vsub.f32 %v1769_v0, %v783_v58 }
 0x120   :  { %v714_v62 = vadd.f32 %v1757_v53, %v578_v57  ;;  %v753_v4 = vpop.xlane.xlu0 %752 }
 0x121   :  { %v878_v3 = vmul.f32 1.442695, %v1946_v59  ;;  %v1961_v0 = vsub.f32 %v1775_v5, %v753_v4 }
 0x122   :  { %v1952_v6 = vsel %vm717_vm0, %v714_v62, -1e+30 }
 0x123   :  { %v1365_v8 = vpop.eup %1364  ;;  %1366 = vpow2.f32 %v878_v3  ;;  %812 = vmax.xlane.f32.xlu1 %v1952_v6  ;;  %780 = vmax.xlane.f32.xlu0 %v1956_v7  ;;  %v848_v13 = vmul.f32 1.442695, %v1961_v0 }
 0x124   :  { %910 = vadd.xlane.f32.xlu2 %v1365_v8 }
 0x126   :  { %v785_v53 = vpop.xlane.xlu2 %784 }
 0x127   :  { %v1964_v9 = vsub.f32 %v1781_v10, %v785_v53 }
 0x128   :  { %v755_v16 = vpop.xlane.xlu1 %754 }
 0x129   :  { %v1367_v51 = vpop.eup %1366  ;;  %v880_v18 = vmul.f32 1.442695, %v1964_v9  ;;  %v1969_v19 = vsub.f32 %v1787_v15, %v755_v16 }
 0x12b   :  { %1368 = vpow2.f32 %v880_v18  ;;  %942 = vadd.xlane.f32.xlu0 %v1367_v51  ;;  %v850_v5 = vmul.f32 1.442695, %v1969_v19 }
 0x12c   :  { %1370 = vpow2.f32 %v848_v13 }
 0x12d   :  { %1372 = vpow2.f32 %v850_v5 }
 0x12e   :  { %v787_v22 = vpop.xlane.xlu0 %786 }
 0x12f   :  { %v1973_v23 = vsub.f32 %v1793_v20, %v787_v22 }
 0x130   :  { %v757_v10 = vpop.xlane.xlu1 %756 }
 0x131   :  { %v1369_v26 = vpop.eup %1368  ;;  %v882_v27 = vmul.f32 1.442695, %v1973_v23  ;;  %v1977_v15 = vsub.f32 %v1799_v25, %v757_v10 }
 0x132   :  { %v1371_v28 = vpop.eup %1370  ;;  %944 = vadd.xlane.f32.xlu1 %v1369_v26 }
 0x133   :  { %1374 = vpow2.f32 %v882_v27  ;;  %912 = vadd.xlane.f32.xlu0 %v1371_v28  ;;  %v852_v29 = vmul.f32 1.442695, %v1977_v15  ;;  %v1373_v32 = vpop.eup %1372 }
 0x135   :  { %1376 = vpow2.f32 %v852_v29 }
 0x138   :  { %v759_v33 = vpop.xlane.xlu2 %758  ;;  %v789_v38 = vpop.xlane.xlu1 %788 }
 0x139   :  { %v1375_v39 = vpop.eup %1374  ;;  %v1981_v20 = vsub.f32 %v1810_v35, %v789_v38  ;;  %v1985_v41 = vsub.f32 %v1806_v34, %v759_v33 }
 0x13a   :  { %914 = vadd.xlane.f32.xlu1 %v1373_v32  ;;  %946 = vadd.xlane.f32.xlu2 %v1375_v39 }
 0x13b   :  { %v884_v40 = vmul.f32 1.442695, %v1981_v20  ;;  %v1377_v42 = vpop.eup %1376  ;;  %v854_v50 = vmul.f32 1.442695, %v1985_v41 }
 0x13d   :  { %1378 = vpow2.f32 %v884_v40 }
 0x140   :  { %v791_v25 = vpop.xlane.xlu2 %790 }
 0x141   :  { %v1988_v45 = vsub.f32 %v1817_v43, %v791_v25 }
 0x142   :  { %916 = vadd.xlane.f32.xlu2 %v1377_v42 }
 0x143   :  { %v886_v35 = vmul.f32 1.442695, %v1988_v45  ;;  %v1379_v54 = vpop.eup %1378 }
 0x144   :  { %948 = vadd.xlane.f32.xlu0 %v1379_v54 }
 0x145   :  { %1380 = vpow2.f32 %v886_v35 }
 0x146   :  { %1382 = vpow2.f32 %v854_v50  ;;  %v793_v56 = vpop.xlane.xlu0 %792 }
 0x147   :  { %v1993_v57 = vsub.f32 %v1824_v49, %v793_v56 }
 0x148   :  { %v761_v34 = vpop.xlane.xlu2 %760 }
 0x149   :  { %v888_v58 = vmul.f32 1.442695, %v1993_v57  ;;  %v1997_v60 = vsub.f32 %v1829_v55, %v761_v34 }
 0x14b   :  { %v1381_v43 = vpop.eup %1380  ;;  %1384 = vpow2.f32 %v888_v58  ;;  %v856_v62 = vmul.f32 1.442695, %v1997_v60 }
 0x14c   :  { %v1383_v3 = vpop.eup %1382  ;;  %950 = vadd.xlane.f32.xlu1 %v1381_v43 }
 0x14d   :  { %1386 = vpow2.f32 %v856_v62  ;;  %918 = vadd.xlane.f32.xlu0 %v1383_v3 }
 0x14e   :  { %v795_v4 = vpop.xlane.xlu1 %794  ;;  %v763_v8 = vpop.xlane.xlu0 %762 }
 0x14f   :  { %v2001_v53 = vsub.f32 %v1840_v63, %v795_v4  ;;  %v2004_v49 = vsub.f32 %v1836_v61, %v763_v8 }
 0x151   :  { %v1385_v13 = vpop.eup %1384  ;;  %v890_v55 = vmul.f32 1.442695, %v2001_v53  ;;  %v858_v16 = vmul.f32 1.442695, %v2004_v49 }
 0x152   :  { %952 = vadd.xlane.f32.xlu2 %v1385_v13 }
 0x153   :  { %v1387_v51 = vpop.eup %1386  ;;  %1388 = vpow2.f32 %v890_v55 }
 0x154   :  { %1390 = vpow2.f32 %v858_v16  ;;  %920 = vadd.xlane.f32.xlu1 %v1387_v51 }
 0x156   :  { %v797_v18 = vpop.xlane.xlu2 %796  ;;  %v765_v5 = vpop.xlane.xlu1 %764 }
 0x157   :  { %v2009_v22 = vsub.f32 %v1848_v11, %v797_v18  ;;  %v2012_v63 = vsub.f32 %v1852_v12, %v765_v5 }
 0x159   :  { %v1389_v61 = vpop.eup %1388  ;;  %v892_v10 = vmul.f32 1.442695, %v2009_v22  ;;  %v860_v26 = vmul.f32 1.442695, %v2012_v63 }
 0x15a   :  { %v1391_v27 = vpop.eup %1390  ;;  %954 = vadd.xlane.f32.xlu0 %v1389_v61 }
 0x15b   :  { %1392 = vpow2.f32 %v892_v10  ;;  %922 = vadd.xlane.f32.xlu2 %v1391_v27 }
 0x15c   :  { %1394 = vpow2.f32 %v860_v26 }
 0x15e   :  { %v767_v28 = vpop.xlane.xlu2 %766  ;;  %v799_v29 = vpop.xlane.xlu0 %798 }
 0x15f   :  { %v2017_v32 = vsub.f32 %v1859_v21, %v767_v28  ;;  %v2020_v11 = vsub.f32 %v1864_v24, %v799_v29 }
 0x161   :  { %v1393_v12 = vpop.eup %1392  ;;  %v862_v33 = vmul.f32 1.442695, %v2017_v32  ;;  %v894_v38 = vmul.f32 1.442695, %v2020_v11 }
 0x162   :  { %v1395_v39 = vpop.eup %1394  ;;  %956 = vadd.xlane.f32.xlu1 %v1393_v12 }
 0x163   :  { %1396 = vpow2.f32 %v862_v33  ;;  %924 = vadd.xlane.f32.xlu0 %v1395_v39 }
 0x164   :  { %1398 = vpow2.f32 %v894_v38 }
 0x166   :  { %v801_v40 = vpop.xlane.xlu1 %800  ;;  %v769_v25 = vpop.xlane.xlu0 %768 }
 0x167   :  { %v2025_v42 = vsub.f32 %v1872_v36, %v801_v40  ;;  %v2028_v21 = vsub.f32 %v1876_v37, %v769_v25 }
 0x169   :  { %v1397_v24 = vpop.eup %1396  ;;  %v896_v50 = vmul.f32 1.442695, %v2025_v42  ;;  %v864_v35 = vmul.f32 1.442695, %v2028_v21 }
 0x16a   :  { %v1399_v54 = vpop.eup %1398  ;;  %926 = vadd.xlane.f32.xlu1 %v1397_v24 }
 0x16b   :  { %1400 = vpow2.f32 %v896_v50  ;;  %958 = vadd.xlane.f32.xlu2 %v1399_v54 }
 0x16c   :  { %1402 = vpow2.f32 %v864_v35 }
 0x16e   :  { %v803_v56 = vpop.xlane.xlu2 %802  ;;  %v771_v34 = vpop.xlane.xlu1 %770 }
 0x16f   :  { %v2033_v58 = vsub.f32 %v1888_v48, %v803_v56  ;;  %v2036_v36 = vsub.f32 %v1884_v46, %v771_v34 }
 0x171   :  { %v1401_v37 = vpop.eup %1400  ;;  %v898_v43 = vmul.f32 1.442695, %v2033_v58  ;;  %v866_v62 = vmul.f32 1.442695, %v2036_v36 }
 0x172   :  { %v1403_v3 = vpop.eup %1402  ;;  %960 = vadd.xlane.f32.xlu0 %v1401_v37 }
 0x173   :  { %1404 = vpow2.f32 %v898_v43  ;;  %928 = vadd.xlane.f32.xlu2 %v1403_v3 }
 0x174   :  { %1406 = vpow2.f32 %v866_v62 }
 0x176   :  { %v773_v4 = vpop.xlane.xlu2 %772  ;;  %v805_v8 = vpop.xlane.xlu0 %804 }
 0x177   :  { %v2041_v13 = vsub.f32 %v1896_v1, %v773_v4  ;;  %v2044_v48 = vsub.f32 %v1900_v2, %v805_v8 }
 0x179   :  { %v1405_v46 = vpop.eup %1404  ;;  %v868_v55 = vmul.f32 1.442695, %v2041_v13  ;;  %v900_v16 = vmul.f32 1.442695, %v2044_v48 }
 0x17a   :  { %v1407_v51 = vpop.eup %1406  ;;  %962 = vadd.xlane.f32.xlu1 %v1405_v46 }
 0x17b   :  { %1408 = vpow2.f32 %v868_v55  ;;  %930 = vadd.xlane.f32.xlu0 %v1407_v51 }
 0x17c   :  { %1410 = vpow2.f32 %v900_v16 }
 0x17e   :  { %v807_v18 = vpop.xlane.xlu1 %806  ;;  %v775_v5 = vpop.xlane.xlu0 %774 }
 0x17f   :  { %v2049_v61 = vsub.f32 %v1912_v17, %v807_v18  ;;  %v2052_v1 = vsub.f32 %v1908_v14, %v775_v5 }
 0x181   :  { %v1409_v2 = vpop.eup %1408  ;;  %v902_v10 = vmul.f32 1.442695, %v2049_v61  ;;  %v870_v26 = vmul.f32 1.442695, %v2052_v1 }
 0x182   :  { %v1411_v27 = vpop.eup %1410  ;;  %932 = vadd.xlane.f32.xlu1 %v1409_v2 }
 0x183   :  { %1412 = vpow2.f32 %v902_v10  ;;  %964 = vadd.xlane.f32.xlu2 %v1411_v27 }
 0x184   :  { %1414 = vpow2.f32 %v870_v26 }
 0x186   :  { %v809_v28 = vpop.xlane.xlu2 %808  ;;  %v777_v29 = vpop.xlane.xlu1 %776 }
 0x187   :  { %v2057_v12 = vsub.f32 %v1924_v31, %v777_v29  ;;  %v2065_v50 = vsub.f32 %v1920_v30, %v809_v28 }
 0x189   :  { %v1413_v17 = vpop.eup %1412  ;;  %v872_v33 = vmul.f32 1.442695, %v2057_v12  ;;  %v904_v31 = vmul.f32 1.442695, %v2065_v50 }
 0x18a   :  { %v1415_v14 = vpop.eup %1414  ;;  %966 = vadd.xlane.f32.xlu0 %v1413_v17 }
 0x18b   :  { %934 = vadd.xlane.f32.xlu2 %v1415_v14  ;;  %1416 = vpow2.f32 %v872_v33 }
 0x18e   :  { %v779_v38 = vpop.xlane.xlu2 %778  ;;  %v811_v39 = vpop.xlane.xlu0 %810 }
 0x18f   :  { %v2061_v40 = vsub.f32 %v1931_v44, %v779_v38  ;;  %v2077_v62 = vsub.f32 %v1939_v52, %v811_v39 }
 0x191   :  { %v874_v25 = vmul.f32 1.442695, %v2061_v40  ;;  %v1417_v24 = vpop.eup %1416  ;;  %v906_v8 = vmul.f32 1.442695, %v2077_v62 }
 0x192   :  { %936 = vadd.xlane.f32.xlu0 %v1417_v24 }
 0x193   :  { %1418 = vpow2.f32 %v874_v25 }
 0x196   :  { %v813_v35 = vpop.xlane.xlu1 %812  ;;  %v781_v54 = vpop.xlane.xlu0 %780 }
 0x197   :  { %v2069_v56 = vsub.f32 %v1952_v6, %v813_v35  ;;  %v2072_v34 = vsub.f32 %v1956_v7, %v781_v54  ;;  %v911_v44 = vpop.xlane.xlu2 %910 }
 0x198   :  { %1420 = vlog2.f32 %v911_v44 }
 0x199   :  { %v1419_v37 = vpop.eup %1418  ;;  %v908_v43 = vmul.f32 1.442695, %v2069_v56  ;;  %v876_v30 = vmul.f32 1.442695, %v2072_v34  ;;  %1422 = vpow2.f32 %v904_v31 }
 0x19a   :  { %938 = vadd.xlane.f32.xlu1 %v1419_v37 }
 0x19b   :  { %1424 = vpow2.f32 %v908_v43 }
 0x19c   :  { %1426 = vpow2.f32 %v876_v30 }
 0x19e   :  { %v1421_v3 = vpop.eup %1420  ;;  %v943_v6 = vpop.xlane.xlu0 %942 }
 0x19f   :  { %v975_v4 = vmul.f32 0.6931472, %v1421_v3  ;;  %1428 = vlog2.f32 %v943_v6  ;;  %v1423_v7 = vpop.eup %1422 }
 0x1a0   :  { %1430 = vpow2.f32 %v906_v8 }
 0x1a1   :  { %v1425_v46 = vpop.eup %1424  ;;  %v1038_v55 = vsub.f32 %v1935_v47, %v975_v4 }
 0x1a2   :  { %v1427_v16 = vpop.eup %1426  ;;  %968 = vadd.xlane.f32.xlu1 %v1423_v7  ;;  %972 = vadd.xlane.f32.xlu0 %v1425_v46 }
 0x1a3   :  { %1070 = vst [vmem:[%s2211_s3] sm:$0xff] %v1038_v55  ;;  %940 = vadd.xlane.f32.xlu2 %v1427_v16 }
 0x1a5   :  { %v1429_v52 = vpop.eup %1428  ;;  %v945_v51 = vpop.xlane.xlu1 %944 }
 0x1a6   :  { %v1007_v18 = vmul.f32 0.6931472, %v1429_v52  ;;  %1432 = vlog2.f32 %v945_v51  ;;  %v913_v5 = vpop.xlane.xlu0 %912  ;;  %v1431_v10 = vpop.eup %1430 }
 0x1a7   :  { %1434 = vlog2.f32 %v913_v5 }
 0x1a8   :  { %v1054_v2 = vsub.f32 %v1946_v59, %v1007_v18 }
 0x1aa   :  { %1086 = vst [vmem:[%s2211_s3 + $0x80] sm:$0xff] %v1054_v2 }
 0x1ab   :  { %970 = vadd.xlane.f32.xlu2 %v1431_v10 }
 0x1ac   :  { %v1433_v47 = vpop.eup %1432 }
 0x1ad   :  { %v1435_v26 = vpop.eup %1434  ;;  %v1009_v27 = vmul.f32 0.6931472, %v1433_v47  ;;  %v915_v28 = vpop.xlane.xlu1 %914 }
 0x1ae   :  { %v947_v29 = vpop.xlane.xlu2 %946  ;;  %v977_v17 = vmul.f32 0.6931472, %v1435_v26  ;;  %1436 = vlog2.f32 %v915_v28 }
 0x1af   :  { %v1055_v33 = vsub.f32 %v1964_v9, %v1009_v27  ;;  %1438 = vlog2.f32 %v947_v29 }
 0x1b0   :  { %v1039_v14 = vsub.f32 %v1961_v0, %v977_v17 }
 0x1b1   :  { %1087 = vst [vmem:[%s2211_s3 + $0x88] sm:$0xff] %v1055_v33 }
 0x1b2   :  { %1071 = vst [vmem:[%s2211_s3 + $0x8] sm:$0xff] %v1039_v14 }
 0x1b4   :  { %v1437_v59 = vpop.eup %1436 }
 0x1b5   :  { %v1439_v38 = vpop.eup %1438  ;;  %v979_v39 = vmul.f32 0.6931472, %v1437_v59 }
 0x1b6   :  { %v917_v25 = vpop.xlane.xlu2 %916  ;;  %v1011_v24 = vmul.f32 0.6931472, %v1439_v38 }
 0x1b7   :  { %1440 = vlog2.f32 %v917_v25  ;;  %v1040_v31 = vsub.f32 %v1969_v19, %v979_v39  ;;  %v949_v35 = vpop.xlane.xlu0 %948 }
 0x1b8   :  { %v1056_v9 = vsub.f32 %v1973_v23, %v1011_v24  ;;  %1442 = vlog2.f32 %v949_v35 }
 0x1b9   :  { %1072 = vst [vmem:[%s2211_s3 + $0x10] sm:$0xff] %v1040_v31 }
 0x1ba   :  { %1088 = vst [vmem:[%s2211_s3 + $0x90] sm:$0xff] %v1056_v9 }
 0x1bd   :  { %v1441_v0 = vpop.eup %1440 }
 0x1be   :  { %v981_v54 = vmul.f32 0.6931472, %v1441_v0  ;;  %v1443_v44 = vpop.eup %1442 }
 0x1bf   :  { %v951_v43 = vpop.xlane.xlu1 %950  ;;  %v1013_v30 = vmul.f32 0.6931472, %v1443_v44 }
 0x1c0   :  { %v1041_v37 = vsub.f32 %v1977_v15, %v981_v54  ;;  %1444 = vlog2.f32 %v951_v43  ;;  %v919_v19 = vpop.xlane.xlu0 %918 }
 0x1c1   :  { %1446 = vlog2.f32 %v919_v19  ;;  %v1057_v23 = vsub.f32 %v1981_v20, %v1013_v30 }
 0x1c2   :  { %1073 = vst [vmem:[%s2211_s3 + $0x18] sm:$0xff] %v1041_v37 }
 0x1c3   :  { %1089 = vst [vmem:[%s2211_s3 + $0x98] sm:$0xff] %v1057_v23 }
 0x1c5   :  { %v953_v3 = vpop.xlane.xlu2 %952 }
 0x1c6   :  { %v1445_v6 = vpop.eup %1444  ;;  %1448 = vlog2.f32 %v953_v3 }
 0x1c7   :  { %v1447_v4 = vpop.eup %1446  ;;  %v1015_v15 = vmul.f32 0.6931472, %v1445_v6  ;;  %v921_v7 = vpop.xlane.xlu1 %920 }
 0x1c8   :  { %v983_v8 = vmul.f32 0.6931472, %v1447_v4  ;;  %1450 = vlog2.f32 %v921_v7 }
 0x1c9   :  { %v1058_v46 = vsub.f32 %v1988_v45, %v1015_v15 }
 0x1ca   :  { %v1042_v55 = vsub.f32 %v1985_v41, %v983_v8 }
 0x1cb   :  { %1090 = vst [vmem:[%s2211_s3 + $0xa0] sm:$0xff] %v1058_v46 }
 0x1cc   :  { %v1449_v20 = vpop.eup %1448  ;;  %1074 = vst [vmem:[%s2211_s3 + $0x20] sm:$0xff] %v1042_v55 }
 0x1cd   :  { %v1017_v16 = vmul.f32 0.6931472, %v1449_v20  ;;  %v955_v52 = vpop.xlane.xlu0 %954 }
 0x1ce   :  { %v1451_v51 = vpop.eup %1450  ;;  %v923_v18 = vpop.xlane.xlu2 %922  ;;  %1452 = vlog2.f32 %v955_v52 }
 0x1cf   :  { %v1059_v5 = vsub.f32 %v1993_v57, %v1017_v16  ;;  %v985_v2 = vmul.f32 0.6931472, %v1451_v51  ;;  %1454 = vlog2.f32 %v923_v18 }
 0x1d1   :  { %1091 = vst [vmem:[%s2211_s3 + $0xa8] sm:$0xff] %v1059_v5  ;;  %v1043_v41 = vsub.f32 %v1997_v60, %v985_v2 }
 0x1d3   :  { %1075 = vst [vmem:[%s2211_s3 + $0x28] sm:$0xff] %v1043_v41 }
 0x1d4   :  { %v1453_v45 = vpop.eup %1452 }
 0x1d5   :  { %v1455_v10 = vpop.eup %1454  ;;  %v1019_v47 = vmul.f32 0.6931472, %v1453_v45  ;;  %v957_v26 = vpop.xlane.xlu1 %956 }
 0x1d6   :  { %v987_v27 = vmul.f32 0.6931472, %v1455_v10  ;;  %1456 = vlog2.f32 %v957_v26  ;;  %v925_v28 = vpop.xlane.xlu0 %924 }
 0x1d7   :  { %v1060_v57 = vsub.f32 %v2001_v53, %v1019_v47  ;;  %1458 = vlog2.f32 %v925_v28 }
 0x1d8   :  { %v1044_v29 = vsub.f32 %v2004_v49, %v987_v27 }
 0x1d9   :  { %1092 = vst [vmem:[%s2211_s3 + $0xb0] sm:$0xff] %v1060_v57 }
 0x1da   :  { %1076 = vst [vmem:[%s2211_s3 + $0x30] sm:$0xff] %v1044_v29 }
 0x1dc   :  { %v1457_v60 = vpop.eup %1456 }
 0x1dd   :  { %v1459_v17 = vpop.eup %1458  ;;  %v1021_v33 = vmul.f32 0.6931472, %v1457_v60  ;;  %v927_v14 = vpop.xlane.xlu1 %926 }
 0x1de   :  { %v989_v59 = vmul.f32 0.6931472, %v1459_v17  ;;  %1460 = vlog2.f32 %v927_v14  ;;  %v959_v38 = vpop.xlane.xlu2 %958 }
 0x1df   :  { %v1061_v53 = vsub.f32 %v2009_v22, %v1021_v33  ;;  %1462 = vlog2.f32 %v959_v38 }
 0x1e0   :  { %v1045_v49 = vsub.f32 %v2012_v63, %v989_v59 }
 0x1e1   :  { %1093 = vst [vmem:[%s2211_s3 + $0xb8] sm:$0xff] %v1061_v53 }
 0x1e2   :  { %1077 = vst [vmem:[%s2211_s3 + $0x38] sm:$0xff] %v1045_v49 }
 0x1e4   :  { %v1461_v39 = vpop.eup %1460 }
 0x1e5   :  { %v1463_v25 = vpop.eup %1462  ;;  %v991_v24 = vmul.f32 0.6931472, %v1461_v39  ;;  %v961_v31 = vpop.xlane.xlu0 %960 }
 0x1e6   :  { %v1023_v9 = vmul.f32 0.6931472, %v1463_v25  ;;  %v929_v35 = vpop.xlane.xlu2 %928  ;;  %1464 = vlog2.f32 %v961_v31 }
 0x1e7   :  { %v1046_v22 = vsub.f32 %v2017_v32, %v991_v24  ;;  %1466 = vlog2.f32 %v929_v35 }
 0x1e8   :  { %v1062_v63 = vsub.f32 %v2020_v11, %v1023_v9 }
 0x1e9   :  { %1078 = vst [vmem:[%s2211_s3 + $0x40] sm:$0xff] %v1046_v22 }
 0x1ea   :  { %1094 = vst [vmem:[%s2211_s3 + $0xc0] sm:$0xff] %v1062_v63 }
 0x1ec   :  { %v1465_v0 = vpop.eup %1464 }
 0x1ed   :  { %v1467_v54 = vpop.eup %1466  ;;  %v1025_v44 = vmul.f32 0.6931472, %v1465_v0  ;;  %v963_v37 = vpop.xlane.xlu1 %962 }
 0x1ee   :  { %v993_v43 = vmul.f32 0.6931472, %v1467_v54  ;;  %1468 = vlog2.f32 %v963_v37  ;;  %v931_v30 = vpop.xlane.xlu0 %930 }
 0x1ef   :  { %v1063_v32 = vsub.f32 %v2025_v42, %v1025_v44  ;;  %1470 = vlog2.f32 %v931_v30 }
 0x1f0   :  { %v1047_v11 = vsub.f32 %v2028_v21, %v993_v43 }
 0x1f1   :  { %1095 = vst [vmem:[%s2211_s3 + $0xc8] sm:$0xff] %v1063_v32 }
 0x1f2   :  { %1079 = vst [vmem:[%s2211_s3 + $0x48] sm:$0xff] %v1047_v11 }
 0x1f4   :  { %v1469_v19 = vpop.eup %1468 }
 0x1f5   :  { %v1471_v23 = vpop.eup %1470  ;;  %v1027_v3 = vmul.f32 0.6931472, %v1469_v19  ;;  %v933_v6 = vpop.xlane.xlu1 %932 }
 0x1f6   :  { %v995_v4 = vmul.f32 0.6931472, %v1471_v23  ;;  %1472 = vlog2.f32 %v933_v6  ;;  %v965_v15 = vpop.xlane.xlu2 %964 }
 0x1f7   :  { %v1064_v42 = vsub.f32 %v2033_v58, %v1027_v3  ;;  %1474 = vlog2.f32 %v965_v15 }
 0x1f8   :  { %v1048_v21 = vsub.f32 %v2036_v36, %v995_v4 }
 0x1f9   :  { %1096 = vst [vmem:[%s2211_s3 + $0xd0] sm:$0xff] %v1064_v42 }
 0x1fa   :  { %1080 = vst [vmem:[%s2211_s3 + $0x50] sm:$0xff] %v1048_v21 }
 0x1fc   :  { %v1473_v7 = vpop.eup %1472 }
 0x1fd   :  { %v1475_v8 = vpop.eup %1474  ;;  %v997_v46 = vmul.f32 0.6931472, %v1473_v7  ;;  %v967_v55 = vpop.xlane.xlu0 %966 }
 0x1fe   :  { %v1029_v20 = vmul.f32 0.6931472, %v1475_v8  ;;  %v935_v16 = vpop.xlane.xlu2 %934  ;;  %1476 = vlog2.f32 %v967_v55 }
 0x1ff   :  { %v1049_v58 = vsub.f32 %v2041_v13, %v997_v46  ;;  %1478 = vlog2.f32 %v935_v16 }
 0x200   :  { %v1065_v36 = vsub.f32 %v2044_v48, %v1029_v20 }
 0x201   :  { %1081 = vst [vmem:[%s2211_s3 + $0x58] sm:$0xff] %v1049_v58 }
 0x202   :  { %1097 = vst [vmem:[%s2211_s3 + $0xd8] sm:$0xff] %v1065_v36 }
 0x204   :  { %v1477_v52 = vpop.eup %1476 }
 0x205   :  { %v1479_v51 = vpop.eup %1478  ;;  %v1031_v18 = vmul.f32 0.6931472, %v1477_v52  ;;  %v937_v2 = vpop.xlane.xlu0 %936 }
 0x206   :  { %v999_v5 = vmul.f32 0.6931472, %v1479_v51  ;;  %1480 = vlog2.f32 %v937_v2 }
 0x207   :  { %v1066_v41 = vsub.f32 %v2049_v61, %v1031_v18 }
 0x208   :  { %v1050_v13 = vsub.f32 %v2052_v1, %v999_v5 }
 0x209   :  { %1098 = vst [vmem:[%s2211_s3 + $0xe0] sm:$0xff] %v1066_v41 }
 0x20a   :  { %1082 = vst [vmem:[%s2211_s3 + $0x60] sm:$0xff] %v1050_v13 }
 0x20c   :  { %v1481_v48 = vpop.eup %1480 }
 0x20d   :  { %v939_v45 = vpop.xlane.xlu1 %938  ;;  %v1001_v10 = vmul.f32 0.6931472, %v1481_v48 }
 0x20e   :  { %1482 = vlog2.f32 %v939_v45 }
 0x20f   :  { %v1051_v47 = vsub.f32 %v2057_v12, %v1001_v10 }
 0x211   :  { %1083 = vst [vmem:[%s2211_s3 + $0x68] sm:$0xff] %v1051_v47 }
 0x214   :  { %v1483_v61 = vpop.eup %1482 }
 0x215   :  { %v1003_v1 = vmul.f32 0.6931472, %v1483_v61  ;;  %v969_v26 = vpop.xlane.xlu1 %968  ;;  %v973_v27 = vpop.xlane.xlu0 %972 }
 0x216   :  { %1484 = vlog2.f32 %v969_v26  ;;  %v941_v28 = vpop.xlane.xlu2 %940 }
 0x217   :  { %v1052_v57 = vsub.f32 %v2061_v40, %v1003_v1  ;;  %1486 = vlog2.f32 %v941_v28 }
 0x218   :  { %1488 = vlog2.f32 %v973_v27 }
 0x219   :  { %1084 = vst [vmem:[%s2211_s3 + $0x70] sm:$0xff] %v1052_v57 }
 0x21c   :  { %v1485_v29 = vpop.eup %1484 }
 0x21d   :  { %v1487_v12 = vpop.eup %1486  ;;  %v1033_v60 = vmul.f32 0.6931472, %v1485_v29 }
 0x21e   :  { %v1489_v17 = vpop.eup %1488  ;;  %v1005_v33 = vmul.f32 0.6931472, %v1487_v12  ;;  %v971_v14 = vpop.xlane.xlu2 %970 }
 0x21f   :  { %v1067_v59 = vsub.f32 %v2065_v50, %v1033_v60  ;;  %v1037_v38 = vmul.f32 0.6931472, %v1489_v17  ;;  %1490 = vlog2.f32 %v971_v14 }
 0x220   :  { %v1053_v53 = vsub.f32 %v2072_v34, %v1005_v33 }
 0x221   :  { %1099 = vst [vmem:[%s2211_s3 + $0xe8] sm:$0xff] %v1067_v59  ;;  %v1069_v40 = vsub.f32 %v2069_v56, %v1037_v38 }
 0x222   :  { %1085 = vst [vmem:[%s2211_s3 + $0x78] sm:$0xff] %v1053_v53 }
 0x223   :  { %1101 = vst [vmem:[%s2211_s3 + $0xf8] sm:$0xff] %v1069_v40 }
 0x225   :  { %v1491_v49 = vpop.eup %1490 }
 0x226   :  { %v1035_v50 = vmul.f32 0.6931472, %v1491_v49 }
 0x228   :  { %v1068_v39 = vsub.f32 %v2077_v62, %v1035_v50 }
 0x22a   :  { %1100 = vst [vmem:[%s2211_s3 + $0xf0] sm:$0xff] %v1068_v39 }

</bundles_post_ra>
